<compile_context>
chip_gen: v7x
topology: tpu7x:2x2x1
jax: 0.10.0
libtpu: 0.0.40
codegen_flags: <defaults>
</compile_context>

<pallas_src>
import functools
import math

import jax
import jax.numpy as jnp
from jax import lax
from jax.experimental import pallas as pl
from jax.experimental.pallas import tpu as pltpu


_VMEM_LIMIT = 32 * 1024 * 1024   # <= v7x 64MiB/TC with headroom; > v5e 16MiB default


# ----------------------------------------------------------------------------
# helpers
# ----------------------------------------------------------------------------
def _round_up(x, m):
    return (x + m - 1) // m * m


def _cpad(c):
    return max(128, _round_up(c, 128))


def _pick_tile(p, cands):
    for c in cands:
        if p % c == 0:
            return c
    return cands[-1]


def _pick_rows(m):
    """Choose (padded_rows, row_tile): one tile when small, <=6% padding when big."""
    mp = _round_up(m, 8)
    if mp <= 512:
        return mp, mp
    best_c, best_pad = None, None
    for c in (512, 256, 128, 64):
        pad = _round_up(m, c) - m
        if pad <= m // 16:
            return _round_up(m, c), c
        if best_pad is None or pad < best_pad:
            best_c, best_pad = c, pad
    return _round_up(m, best_c), best_c


# ----------------------------------------------------------------------------
# Pallas matmul kernel: Y = act((X @ W) + b [+ residual])  (bf16 in, f32 acc)
# ----------------------------------------------------------------------------
def _mm_kernel(x_ref, w_ref, b_ref, *rest, act, has_res):
    if has_res:
        r_ref, o_ref, acc_ref = rest
    else:
        r_ref = None
        o_ref, acc_ref = rest

    k = pl.program_id(2)

    @pl.when(k == 0)
    def _():
        acc_ref[...] = jnp.zeros_like(acc_ref)

    acc_ref[...] += jnp.dot(x_ref[...], w_ref[...],
                            preferred_element_type=jnp.float32)

    @pl.when(k == pl.num_programs(2) - 1)
    def _():
        y = acc_ref[...] + b_ref[...]
        if has_res:
            y = y + r_ref[...].astype(jnp.float32)
        if act:
            y = jnp.maximum(y, 0.0)
        o_ref[...] = y.astype(o_ref.dtype)


def matmul_bias(x, w, b, *, act=False, residual=None):
    """x:(M,K) @ w:(Kp,Np) + b:(1,Np) [+ residual], optional ReLU, bf16 out.

    w/b are pre-padded & pre-cast by prepare_params; K/N are 128 aligned there,
    so the only runtime padding is the 27-wide stem-conv K and (rarely) M.
    """
    M, K = x.shape
    Kp, Np = w.shape
    assert Kp >= K and Kp % 128 == 0 and Np % 128 == 0

    Mp, TM = _pick_rows(M)
    TN = _pick_tile(Np, (512, 256, 128))
    TK = _pick_tile(Kp, (2048, 1024, 768, 512, 384, 256, 128))
    # keep >=2 parallel tiles so both TensorCores get work on v7x megacore
    if Mp // TM == 1 and Np // TN == 1 and TM % 16 == 0:
        TM //= 2

    if (Mp, Kp) != (M, K):
        x = jnp.pad(x, ((0, Mp - M), (0, Kp - K)))
    x = x.astype(jnp.bfloat16)
    w = w.astype(jnp.bfloat16)
    b = b.astype(jnp.float32).reshape(1, Np)

    grid = (Mp // TM, Np // TN, Kp // TK)
    # bias / residual index maps do not depend on k -> Pallas keeps them
    # resident across the whole K strip (fetched once per (i, j)).
    in_specs = [
        pl.BlockSpec((TM, TK), lambda i, j, k: (i, k)),
        pl.BlockSpec((TK, TN), lambda i, j, k: (k, j)),
        pl.BlockSpec((1, TN), lambda i, j, k: (0, j)),
    ]
    args = [x, w, b]
    has_res = residual is not None
    if has_res:
        r = residual.astype(jnp.bfloat16)
        if r.shape != (Mp, Np):
            r = jnp.pad(r, ((0, Mp - r.shape[0]), (0, Np - r.shape[1])))
        in_specs.append(pl.BlockSpec((TM, TN), lambda i, j, k: (i, j)))
        args.append(r)

    kernel = functools.partial(_mm_kernel, act=act, has_res=has_res)
    out = pl.pallas_call(
        kernel,
        out_shape=jax.ShapeDtypeStruct((Mp, Np), jnp.bfloat16),
        grid_spec=pltpu.PrefetchScalarGridSpec(
            num_scalar_prefetch=0,
            grid=grid,
            in_specs=in_specs,
            out_specs=pl.BlockSpec((TM, TN), lambda i, j, k: (i, j)),
            scratch_shapes=[pltpu.VMEM((TM, TN), jnp.float32)],
        ),
        compiler_params=pltpu.CompilerParams(
            dimension_semantics=("parallel", "parallel", "arbitrary"),
            vmem_limit_bytes=_VMEM_LIMIT),
    )(*args)
    if Mp != M:
        out = out[:M]
    return out


# ----------------------------------------------------------------------------
# Direct (no-im2col) stride-1 dilated 3x3 conv, flat-halo layout + manual DMA.
# ----------------------------------------------------------------------------
def _dconv_kernel(x_hbm, w_ref, b_ref, o_ref, xwin, sem, acc_ref,
                  *, shifts, tm, win, n_i):
    n = pl.program_id(0)
    i = pl.program_id(1)
    j = pl.program_id(2)
    slot = i % 2

    def window_copy(row_tile, slot_):
        src = x_hbm.at[n, pl.ds(row_tile * tm, win), :]
        return pltpu.make_async_copy(src, xwin.at[slot_], sem.at[slot_])

    # First window of this image: nothing was prefetched yet (per-image DMA
    # pipeline keeps the 'n' grid axis megacore-safe).
    @pl.when((i == 0) & (j == 0))
    def _():
        window_copy(0, 0).start()

    # New window: wait for its DMA, then prefetch the next window of the image.
    @pl.when(j == 0)
    def _():
        window_copy(i, slot).wait()

        @pl.when(i + 1 < n_i)
        def _():
            window_copy(i + 1, 1 - slot).start()

    acc_ref[...] = jnp.zeros_like(acc_ref)
    for t, s in enumerate(shifts):
        xs = xwin[slot, pl.ds(s, tm), :]                 # shifted tap window
        acc_ref[...] += jnp.dot(xs, w_ref[t],
                                preferred_element_type=jnp.float32)
    y = jnp.maximum(acc_ref[...] + b_ref[...], 0.0)      # bias + ReLU epilogue
    o_ref[0] = y.astype(o_ref.dtype)


def conv3x3_direct(x, w9, b, *, dilation):
    """Stride-1 3x3 conv, padding == dilation, fused bias+ReLU, bf16 out.

    x: (N,H,W,Cin_p) bf16; w9: (9,Cin_p,Cout_p) bf16; b: (1,Cout_p) f32.
    """
    x = x.astype(jnp.bfloat16)
    N, H, W, C = x.shape
    _, cin_p, cout_p = w9.shape
    assert C == cin_p
    d = dilation
    hp, wp = H + 2 * d, W + 2 * d

    M = H * wp                                   # output rows/image (wide layout)
    Mp, TM = _pick_rows(M)
    I = Mp // TM
    TN = min(512, cout_p)
    J = cout_p // TN
    max_shift = (2 * wp + 2) * d
    WIN = _round_up(TM + max_shift, 8)
    ROWS = Mp + WIN
    shifts = tuple((kh * wp + kw) * d for kh in range(3) for kw in range(3))

    xp = jnp.pad(x, ((0, 0), (d, d), (d, d), (0, 0)))
    xf = xp.reshape(N, hp * wp, C)
    xf = jnp.pad(xf, ((0, 0), (0, ROWS - hp * wp), (0, 0)))

    kernel = functools.partial(_dconv_kernel, shifts=shifts, tm=TM, win=WIN,
                               n_i=I)
    out = pl.pallas_call(
        kernel,
        out_shape=jax.ShapeDtypeStruct((N, Mp, cout_p), jnp.bfloat16),
        grid_spec=pltpu.PrefetchScalarGridSpec(
            num_scalar_prefetch=0,
            grid=(N, I, J),
            in_specs=[
                pl.BlockSpec(memory_space=pl.ANY),                  # flat act
                pl.BlockSpec((9, cin_p, TN), lambda n, i, j: (0, 0, j)),
                pl.BlockSpec((1, TN), lambda n, i, j: (0, j)),
            ],
            out_specs=pl.BlockSpec((1, TM, TN), lambda n, i, j: (n, i, j)),
            scratch_shapes=[
                pltpu.VMEM((2, WIN, cin_p), jnp.bfloat16),          # dbl buffer
                pltpu.SemaphoreType.DMA((2,)),
                pltpu.VMEM((TM, TN), jnp.float32),
            ],
        ),
        compiler_params=pltpu.CompilerParams(
            dimension_semantics=("parallel", "arbitrary", "arbitrary"),
            vmem_limit_bytes=_VMEM_LIMIT),
    )(xf, w9, b.astype(jnp.float32))
    y = out[:, :H * wp, :].reshape(N, H, wp, cout_p)[:, :, :W, :]
    return y


# ----------------------------------------------------------------------------
# im2col fallback (only for the 3 stride-2 3x3 convs) and 1x1 convs
# ----------------------------------------------------------------------------
def conv3x3_im2col(x, wmat, b, *, stride, padding, dilation, act=True):
    N, H, W, C = x.shape
    KH = KW = 3
    OH = (H + 2 * padding - dilation * (KH - 1) - 1) // stride + 1
    OW = (W + 2 * padding - dilation * (KW - 1) - 1) // stride + 1
    xp = jnp.pad(x, ((0, 0), (padding, padding), (padding, padding), (0, 0)))
    cols = []
    for kh in range(KH):
        for kw in range(KW):
            h0 = kh * dilation
            w0 = kw * dilation
            cols.append(xp[:, h0:h0 + (OH - 1) * stride + 1:stride,
                           w0:w0 + (OW - 1) * stride + 1:stride, :])
    patches = jnp.concatenate(cols, axis=-1)
    xm = patches.reshape(N * OH * OW, KH * KW * C)
    y = matmul_bias(xm, wmat, b, act=act)
    return y.reshape(N, OH, OW, wmat.shape[1])


def conv1x1(x, rec, *, stride=1, act=False, residual=None):
    if stride > 1:
        x = x[:, ::stride, ::stride, :]
    N, H, W, C = x.shape
    Np = rec['w'].shape[1]
    res = None if residual is None else residual.reshape(N * H * W, Np)
    y = matmul_bias(x.reshape(N * H * W, C), rec['w'], rec['b'],
                    act=act, residual=res)
    return y.reshape(N, H, W, Np)


def maxpool_3x3_s2_p1(x):
    # TODO(synk): single-pass XLA reduce_window (bf16 NHWC, no layout change).
    init = jnp.array(-jnp.inf, dtype=x.dtype)
    return jax.lax.reduce_window(
        x, init, jax.lax.max,
        window_dimensions=(1, 3, 3, 1),
        window_strides=(1, 2, 2, 1),
        padding=((0, 0), (1, 1), (1, 1), (0, 0)))


# ----------------------------------------------------------------------------
# ECA (stand-in for DA_ECA): tiled over HW, 2-phase grid, fully fused.
# ----------------------------------------------------------------------------
def _eca_kernel(w_sm, x_ref, o_ref, sum_sc, att_sc, *, hw, c, k, nt):
    p = pl.program_id(1)
    t = pl.program_id(2)

    @pl.when((p == 0) & (t == 0))
    def _():
        sum_sc[...] = jnp.zeros_like(sum_sc)

    @pl.when(p == 0)
    def _():
        sum_sc[...] += jnp.sum(x_ref[0], axis=0, keepdims=True,
                               dtype=jnp.float32)

    @pl.when((p == 0) & (t == nt - 1))
    def _():
        mean = sum_sc[...] * (1.0 / hw)
        cp = mean.shape[1]
        lane = lax.broadcasted_iota(jnp.int32, (1, cp), 1)
        pad = (k - 1) // 2
        att = jnp.zeros_like(mean)
        for i in range(k):
            off = i - pad
            sh = pltpu.roll(mean, (-off) % cp, 1)        # sh[c] = mean[c+off]
            valid = jnp.logical_and(lane + off >= 0, lane + off < c)
            att = att + w_sm[i] * jnp.where(valid, sh, 0.0)
        att_sc[...] = jax.nn.sigmoid(att)

    @pl.when(p == 1)
    def _():
        o_ref[0] = x_ref[0] * att_sc[...].astype(o_ref.dtype)


def eca_forward(x, w1d, k, block_rows=1024):
    N, H, W, C = x.shape
    HW = H * W
    THW = min(_round_up(HW, 8), _round_up(block_rows, 8))
    HWp = _round_up(HW, THW)
    T = HWp // THW
    xr = x.reshape(N, HW, C)
    if HWp != HW:
        xr = jnp.pad(xr, ((0, 0), (0, HWp - HW), (0, 0)))
    kernel = functools.partial(_eca_kernel, hw=float(HW), c=C, k=k, nt=T)
    out = pl.pallas_call(
        kernel,
        out_shape=jax.ShapeDtypeStruct((N, HWp, C), x.dtype),
        grid_spec=pltpu.PrefetchScalarGridSpec(
            num_scalar_prefetch=1,
            grid=(N, 2, T),
            in_specs=[pl.BlockSpec((1, THW, C), lambda n, p, t, w: (n, t, 0))],
            # phase 0 never writes real data; park its output index at tile 0
            # (it is overwritten at phase 1, tile 0 before any writeback).
            out_specs=pl.BlockSpec((1, THW, C),
                                   lambda n, p, t, w: (n, t * p, 0)),
            scratch_shapes=[pltpu.VMEM((1, C), jnp.float32),
                            pltpu.VMEM((1, C), jnp.float32)],
        ),
        compiler_params=pltpu.CompilerParams(
            dimension_semantics=("parallel", "arbitrary", "arbitrary"),
            vmem_limit_bytes=_VMEM_LIMIT),
    )(w1d.astype(jnp.float32), xr)
    if HWp != HW:
        out = out[:, :HW, :]
    return out.reshape(N, H, W, C)


# ----------------------------------------------------------------------------
# BN folding, RepVGG reparameterization & one-time weight preparation
# ----------------------------------------------------------------------------
def fold_conv_bn(w, bn):
    std = jnp.sqrt(bn['var'] + bn['eps'])
    t = bn['gamma'] / std
    return w * t[:, None, None, None], bn['beta'] - bn['mean'] * t


def repvgg_equiv(p):
    w3, b3 = fold_conv_bn(p['dense_w'], p['dense_bn'])
    w1, b1 = fold_conv_bn(p['one_w'], p['one_bn'])
    kern = w3 + jnp.pad(w1, ((0, 0), (0, 0), (1, 1), (1, 1)))
    bias = b3 + b1
    if p['id_bn'] is not None:
        c = p['dense_w'].shape[1]
        idx = jnp.arange(c)
        idk = jnp.zeros((c, c, 3, 3), jnp.float32).at[idx, idx, 1, 1].set(1.0)
        wid, bid = fold_conv_bn(idk, p['id_bn'])
        kern = kern + wid
        bias = bias + bid
    return kern, bias


def _prep_matmul(kern, bias, cin_pad, cout_pad):
    cout, cin, kh, kw = kern.shape
    w = jnp.transpose(kern, (2, 3, 1, 0))
    w = jnp.pad(w, ((0, 0), (0, 0), (0, cin_pad - cin), (0, cout_pad - cout)))
    wmat = w.reshape(kh * kw * cin_pad, cout_pad)
    kp = _round_up(wmat.shape[0], 128)
    if kp != wmat.shape[0]:
        wmat = jnp.pad(wmat, ((0, kp - wmat.shape[0]), (0, 0)))
    b = jnp.pad(bias, (0, cout_pad - cout)).reshape(1, cout_pad)
    return {'w': wmat.astype(jnp.bfloat16), 'b': b.astype(jnp.float32)}


def _prep_direct(kern, bias, cin_pad, cout_pad):
    cout, cin, kh, kw = kern.shape
    w = jnp.transpose(kern, (2, 3, 1, 0))
    w = jnp.pad(w, ((0, 0), (0, 0), (0, cin_pad - cin), (0, cout_pad - cout)))
    w9 = w.reshape(kh * kw, cin_pad, cout_pad)
    b = jnp.pad(bias, (0, cout_pad - cout)).reshape(1, cout_pad)
    return {'w9': w9.astype(jnp.bfloat16), 'b': b.astype(jnp.float32)}


def _prep_rep(p, *, stride, cin_act):
    kern, bias = repvgg_equiv(p)
    cout_pad = _cpad(kern.shape[0])
    if stride == 1:
        return _prep_direct(kern, bias, cin_act, cout_pad)
    return _prep_matmul(kern, bias, cin_act, cout_pad)


def _prep_bottleneck(p, *, stride, has_down, cin_act):
    planes = p['w1'].shape[0]
    cmid = _cpad(planes)
    cout = _cpad(planes * 4)
    w1, b1 = fold_conv_bn(p['w1'], p['bn1'])
    w3, b3 = fold_conv_bn(p['w3'], p['bn3'])
    rec = {'conv1': _prep_matmul(w1, b1, cin_act, cmid),
           'rep': _prep_rep(p['rep'], stride=stride, cin_act=cmid),
           'conv3': _prep_matmul(w3, b3, cmid, cout)}
    if has_down:
        wd, bd = fold_conv_bn(p['wd'], p['bnd'])
        rec['down'] = _prep_matmul(wd, bd, cin_act, cout)
    return rec


def prepare_params(params, plan):
    """One-time: fold BN, reparam RepVGG, transpose/pad/cast all weights."""
    prepared = {}
    cin = 3
    stem = []
    for p, (s, _) in zip(params['layer0'], plan['layer0']):
        stem.append(_prep_rep(p, stride=s, cin_act=cin))
        cin = _cpad(p['dense_w'].shape[0])
    prepared['layer0'] = stem
    for name in ('layer1', 'layer2', 'layer3', 'layer4'):
        recs = []
        for p, (s, _, down) in zip(params[name], plan[name]):
            recs.append(_prep_bottleneck(p, stride=s, has_down=down,
                                         cin_act=cin))
            cin = _cpad(p['w3'].shape[0])
        prepared[name] = recs
    prepared['eca_w'] = jnp.asarray(params['eca_w'], jnp.float32)
    return prepared


# ----------------------------------------------------------------------------
# deterministic parameter init (shapes follow the PyTorch module __init__)
# ----------------------------------------------------------------------------
class _Keys:
    def __init__(self, seed):
        self._key = jax.random.PRNGKey(seed)

    def __call__(self):
        self._key, sub = jax.random.split(self._key)
        return sub


def init_conv_w(kg, out_c, in_c, kh, kw):
    fan_in = in_c * kh * kw
    return jax.random.normal(kg(), (out_c, in_c, kh, kw),
                             jnp.float32) / math.sqrt(fan_in)


def init_bn(kg, c):
    return dict(
        gamma=jax.random.uniform(kg(), (c,), jnp.float32, 0.8, 1.2),
        beta=0.05 * jax.random.normal(kg(), (c,), jnp.float32),
        mean=0.05 * jax.random.normal(kg(), (c,), jnp.float32),
        var=jax.random.uniform(kg(), (c,), jnp.float32, 0.8, 1.2),
        eps=1e-5,
    )


def init_repvgg(kg, in_c, out_c, stride):
    return dict(
        dense_w=init_conv_w(kg, out_c, in_c, 3, 3),
        dense_bn=init_bn(kg, out_c),
        one_w=init_conv_w(kg, out_c, in_c, 1, 1),
        one_bn=init_bn(kg, out_c),
        id_bn=init_bn(kg, in_c) if (in_c == out_c and stride == 1) else None,
    )


def init_bottleneck(kg, inplanes, planes, stride, has_down):
    p = dict(
        w1=init_conv_w(kg, planes, inplanes, 1, 1),
        bn1=init_bn(kg, planes),
        rep=init_repvgg(kg, planes, planes, stride),
        w3=init_conv_w(kg, planes * 4, planes, 1, 1),
        bn3=init_bn(kg, planes * 4),
    )
    if has_down:
        p['wd'] = init_conv_w(kg, planes * 4, inplanes, 1, 1)
        p['bnd'] = init_bn(kg, planes * 4)
    return p


# k4 of the module: t4 = int(abs((log2(2048)+1)/2)) = 6 -> k4 = 7
_T4 = int(abs((math.log(2048, 2) + 1) / 2))
_K4 = _T4 if _T4 % 2 else _T4 + 1


def _arch_plan(num_blocks=(1, 1, 1)):
    def layer(n, stride, dilation):
        return [(stride, dilation, True)] + [(1, dilation, False)] * (n - 1)
    return {
        'layer0': [(2, 1), (1, 1), (1, 1)],
        'layer1': layer(num_blocks[0], 1, 1),
        'layer2': layer(num_blocks[1], 2, 1),
        'layer3': layer(num_blocks[2], 2, 1),
        'layer4': [(1, 2, True), (1, 4, False), (1, 8, False)],
    }


def init_model(seed=0, num_blocks=(1, 1, 1)):
    kg = _Keys(seed)
    params = {}
    params['layer0'] = [init_repvgg(kg, i, o, s)
                        for (i, o, s) in ((3, 32, 2), (32, 32, 1), (32, 64, 1))]
    in_planes = [64]

    def make_layer(planes, n, stride):
        layer = [init_bottleneck(kg, in_planes[0], planes, stride, True)]
        in_planes[0] = planes * 4
        for _ in range(1, n):
            layer.append(init_bottleneck(kg, in_planes[0], planes, 1, False))
        return layer

    params['layer1'] = make_layer(64, num_blocks[0], 1)
    params['layer2'] = make_layer(128, num_blocks[1], 2)
    params['layer3'] = make_layer(256, num_blocks[2], 2)
    layer4 = [init_bottleneck(kg, in_planes[0], 512, 1, True)]
    in_planes[0] = 2048
    for _ in range(2):
        layer4.append(init_bottleneck(kg, in_planes[0], 512, 1, False))
    params['layer4'] = layer4
    params['eca_w'] = jax.random.normal(kg(), (_K4,),
                                        jnp.float32) / math.sqrt(_K4)
    return params


# ----------------------------------------------------------------------------
# forward
# ----------------------------------------------------------------------------
def rep_forward(x, rec, *, stride, dilation):
    if stride == 1:
        return conv3x3_direct(x, rec['w9'], rec['b'], dilation=dilation)
    return conv3x3_im2col(x, rec['w'], rec['b'], stride=stride,
                          padding=dilation, dilation=dilation, act=True)


def bottleneck_forward(x, rec, *, stride, dilation, has_down):
    out = conv1x1(x, rec['conv1'], act=True)
    out = rep_forward(out, rec['rep'], stride=stride, dilation=dilation)
    if has_down:
        residual = conv1x1(x, rec['down'], stride=stride, act=False)
    else:
        residual = x
    # conv3 + bias + residual add + ReLU fused in the matmul epilogue
    return conv1x1(out, rec['conv3'], act=True, residual=residual)


def forward(plan, prepared, x_nchw):
    x = jnp.transpose(x_nchw, (0, 2, 3, 1)).astype(jnp.bfloat16)
    for rec, (s, d) in zip(prepared['layer0'], plan['layer0']):
        x = rep_forward(x, rec, stride=s, dilation=d)
    x = maxpool_3x3_s2_p1(x)

    def run(x, recs, plans):
        for rec, (s, d, down) in zip(recs, plans):
            x = bottleneck_forward(x, rec, stride=s, dilation=d, has_down=down)
        return x

    x = run(x, prepared['layer1'], plan['layer1'])
    low_level_feat = x
    x = run(x, prepared['layer2'], plan['layer2'])
    x = run(x, prepared['layer3'], plan['layer3'])
    x = run(x, prepared['layer4'], plan['layer4'])
    x = eca_forward(x, prepared['eca_w'], _K4)

    out = jnp.transpose(x, (0, 3, 1, 2)).astype(jnp.float32)
    low_level_feat = jnp.transpose(low_level_feat,
                                   (0, 3, 1, 2)).astype(jnp.float32)
    return out, low_level_feat


# ----------------------------------------------------------------------------
# in-script numerics checks for the new kernels
# ----------------------------------------------------------------------------
def _conv_ref(x, w9, b, d):
    ref = lax.conv_general_dilated(
        x.astype(jnp.float32),
        w9.reshape(3, 3, w9.shape[1], w9.shape[2]).astype(jnp.float32),
        window_strides=(1, 1), padding=((d, d), (d, d)), rhs_dilation=(d, d),
        dimension_numbers=('NHWC', 'HWIO', 'NHWC'),
        precision=lax.Precision.HIGHEST)
    return jnp.maximum(ref + b.reshape(1, 1, 1, -1), 0.0)


def _self_test():
    keys = jax.random.split(jax.random.PRNGKey(42), 8)

    # direct 3x3 conv (dilation 2) vs XLA reference
    cin, cout, d = 128, 128, 2
    xt = jax.random.normal(keys[0], (1, 10, 12, cin), jnp.float32).astype(jnp.bfloat16)
    wt = (0.05 * jax.random.normal(keys[1], (9, cin, cout), jnp.float32)).astype(jnp.bfloat16)
    bt = 0.1 * jax.random.normal(keys[2], (1, cout), jnp.float32)
    y = conv3x3_direct(xt, wt, bt, dilation=d).astype(jnp.float32)
    ref = _conv_ref(xt, wt, bt, d)
    assert float(jnp.max(jnp.abs(y - ref))) <= 0.05 * float(jnp.max(jnp.abs(ref))) + 1e-2

    # multi-image / multi-window case (exercises the double-buffered DMA path)
    cin, cout, d = 128, 256, 1
    xt = jax.random.normal(keys[3], (2, 24, 20, cin), jnp.float32).astype(jnp.bfloat16)
    wt = (0.05 * jax.random.normal(keys[4], (9, cin, cout), jnp.float32)).astype(jnp.bfloat16)
    bt = jnp.zeros((1, cout), jnp.float32)
    y = conv3x3_direct(xt, wt, bt, dilation=d).astype(jnp.float32)
    ref = _conv_ref(xt, wt, bt, d)
    assert float(jnp.max(jnp.abs(y - ref))) <= 0.05 * float(jnp.max(jnp.abs(ref))) + 1e-2

    # tiled 2-phase ECA vs reference (block_rows=8 forces multiple HW tiles)
    C = 256
    xe = jax.random.normal(keys[5], (2, 4, 6, C), jnp.float32).astype(jnp.bfloat16)
    we = 0.3 * jax.random.normal(keys[6], (_K4,), jnp.float32)
    ye = eca_forward(xe, we, _K4, block_rows=8).astype(jnp.float32)
    xf = xe.astype(jnp.float32)
    mean = xf.mean(axis=(1, 2))
    pad = (_K4 - 1) // 2
    mp = jnp.pad(mean, ((0, 0), (pad, pad)))
    att = sum(we[i] * mp[:, i:i + C] for i in range(_K4))
    refe = xf * jax.nn.sigmoid(att)[:, None, None, :]
    assert float(jnp.max(jnp.abs(ye - refe))) <= 0.05 * float(jnp.max(jnp.abs(refe))) + 1e-2


if __name__ == "__main__":
    _self_test()

    num_blocks = (1, 1, 1)
    params = init_model(seed=0, num_blocks=num_blocks)
    plan = _arch_plan(num_blocks)
    prepared = prepare_params(params, plan)          # one-time weight prep

    fwd = jax.jit(functools.partial(forward, plan))
    x = jax.random.normal(jax.random.PRNGKey(0), (2, 3, 64, 64), jnp.float32)
    out, low = fwd(prepared, x)
    jax.block_until_ready((out, low))

    assert out.shape == (2, 2048, 4, 4), out.shape
    assert low.shape == (2, 256, 16, 16), low.shape
    assert bool(jnp.all(jnp.isfinite(out))) and bool(jnp.all(jnp.isfinite(low)))
    print("KERNEL_OK")
</pallas_src>

<mosaic_0001>
module attributes {stable_mosaic.version = 11 : i64} {
  func.func @_dconv_kernel(%arg0: i32, %arg1: i32, %arg2: i32, %arg3: memref<1x392x128xbf16, #tpu.memory_space<any>>, %arg4: memref<9x128x128xbf16, #tpu.memory_space<vmem>>, %arg5: memref<1x128xf32, #tpu.memory_space<vmem>>, %arg6: memref<1x160x128xbf16, #tpu.memory_space<vmem>>, %arg7: memref<2x232x128xbf16, #tpu.memory_space<vmem>>, %arg8: memref<2x!tpu.dma_semaphore, #tpu.memory_space<semaphore_mem>>, %arg9: memref<160x128xf32, #tpu.memory_space<vmem>>) attributes {dimension_semantics = [#tpu.dimension_semantics<parallel>, #tpu.dimension_semantics<arbitrary>, #tpu.dimension_semantics<arbitrary>], iteration_bounds = array<i64: 1, 1, 1>, scalar_prefetch = 0 : i64, scratch_operands = 3 : i64, tpu.core_type = #tpu.core_type<tc>, window_params = [{}, {transform_indices = @transform_1, window_bounds = array<i64: 9, 128, 128>}, {transform_indices = @transform_2, window_bounds = array<i64: 1, 128>}, {transform_indices = @transform_3, window_bounds = array<i64: 1, 160, 128>}]} {
    %c2_i32 = arith.constant 2 : i32
    %c0_i32 = arith.constant 0 : i32
    %0 = arith.cmpi eq, %c2_i32, %c0_i32 : i32
    %c1_i32 = arith.constant 1 : i32
    %1 = arith.select %0, %c1_i32, %c2_i32 : i32
    %2 = arith.remsi %arg1, %1 : i32
    %c0_i32_0 = arith.constant 0 : i32
    %3 = arith.cmpi ne, %2, %c0_i32_0 : i32
    %c0_i32_1 = arith.constant 0 : i32
    %4 = arith.cmpi slt, %2, %c0_i32_1 : i32
    %c0_i32_2 = arith.constant 0 : i32
    %5 = arith.cmpi slt, %1, %c0_i32_2 : i32
    %6 = arith.xori %4, %5 : i1
    %7 = arith.andi %6, %3 : i1
    %8 = arith.addi %2, %1 : i32
    %9 = arith.select %7, %8, %2 : i32
    %c0_i32_3 = arith.constant 0 : i32
    %10 = arith.cmpi eq, %arg1, %c0_i32_3 : i32
    %c0_i32_4 = arith.constant 0 : i32
    %11 = arith.cmpi eq, %arg2, %c0_i32_4 : i32
    %12 = arith.andi %10, %11 : i1
    %13 = arith.extui %12 : i1 to i32
    %c0_i32_5 = arith.constant 0 : i32
    %14 = arith.cmpi ne, %13, %c0_i32_5 : i32
    scf.if %14 {
      %c0_i32_93 = arith.constant 0 : i32
      %c0_i32_94 = arith.constant 0 : i32
      %c0_i32_95 = arith.constant 0 : i32
      %c0_i32_96 = arith.constant 0 : i32
      %111 = tpu.memref_slice %arg3[%arg0, %c0_i32_95, %c0_i32_96] : memref<1x392x128xbf16, #tpu.memory_space<any>> -> memref<1x232x128xbf16, #tpu.memory_space<any>>
      %112 = tpu.memref_squeeze %111 : memref<1x232x128xbf16, #tpu.memory_space<any>> -> memref<232x128xbf16, #tpu.memory_space<any>>
      %c0_i32_97 = arith.constant 0 : i32
      %c0_i32_98 = arith.constant 0 : i32
      %113 = tpu.memref_slice %arg7[%c0_i32_93, %c0_i32_97, %c0_i32_98] : memref<2x232x128xbf16, #tpu.memory_space<vmem>> -> memref<1x232x128xbf16, #tpu.memory_space<vmem>>
      %114 = tpu.memref_squeeze %113 : memref<1x232x128xbf16, #tpu.memory_space<vmem>> -> memref<232x128xbf16, #tpu.memory_space<vmem>>
      %115 = tpu.memref_slice %arg8[%c0_i32_94] : memref<2x!tpu.dma_semaphore, #tpu.memory_space<semaphore_mem>> -> memref<1x!tpu.dma_semaphore, #tpu.memory_space<semaphore_mem>>
      %116 = tpu.memref_squeeze %115 : memref<1x!tpu.dma_semaphore, #tpu.memory_space<semaphore_mem>> -> memref<!tpu.dma_semaphore, #tpu.memory_space<semaphore_mem>>
      tpu.enqueue_dma source(%112 : memref<232x128xbf16, #tpu.memory_space<any>>) target(%114 : memref<232x128xbf16, #tpu.memory_space<vmem>>) target_semaphore(%116 : memref<!tpu.dma_semaphore, #tpu.memory_space<semaphore_mem>>)
    } else {
    }
    %c0_i32_6 = arith.constant 0 : i32
    %15 = arith.cmpi eq, %arg2, %c0_i32_6 : i32
    %16 = arith.extui %15 : i1 to i32
    %c0_i32_7 = arith.constant 0 : i32
    %17 = arith.cmpi ne, %16, %c0_i32_7 : i32
    scf.if %17 {
      %c160_i32 = arith.constant 160 : i32
      %111 = arith.muli %arg1, %c160_i32 : i32
      %c0_i32_93 = arith.constant 0 : i32
      %112 = tpu.memref_slice %arg3[%arg0, %111, %c0_i32_93] : memref<1x392x128xbf16, #tpu.memory_space<any>> -> memref<1x232x128xbf16, #tpu.memory_space<any>>
      %113 = tpu.memref_squeeze %112 : memref<1x232x128xbf16, #tpu.memory_space<any>> -> memref<232x128xbf16, #tpu.memory_space<any>>
      %c0_i32_94 = arith.constant 0 : i32
      %c0_i32_95 = arith.constant 0 : i32
      %114 = tpu.memref_slice %arg7[%9, %c0_i32_94, %c0_i32_95] : memref<2x232x128xbf16, #tpu.memory_space<vmem>> -> memref<1x232x128xbf16, #tpu.memory_space<vmem>>
      %115 = tpu.memref_squeeze %114 : memref<1x232x128xbf16, #tpu.memory_space<vmem>> -> memref<232x128xbf16, #tpu.memory_space<vmem>>
      %116 = tpu.memref_slice %arg8[%9] : memref<2x!tpu.dma_semaphore, #tpu.memory_space<semaphore_mem>> -> memref<1x!tpu.dma_semaphore, #tpu.memory_space<semaphore_mem>>
      %117 = tpu.memref_squeeze %116 : memref<1x!tpu.dma_semaphore, #tpu.memory_space<semaphore_mem>> -> memref<!tpu.dma_semaphore, #tpu.memory_space<semaphore_mem>>
      tpu.wait_dma2 semaphore(%117 : memref<!tpu.dma_semaphore, #tpu.memory_space<semaphore_mem>>) src(%113 : memref<232x128xbf16, #tpu.memory_space<any>>) dst(%115 : memref<232x128xbf16, #tpu.memory_space<vmem>>)
      %c1_i32_96 = arith.constant 1 : i32
      %118 = arith.addi %arg1, %c1_i32_96 : i32
      %c1_i32_97 = arith.constant 1 : i32
      %119 = arith.cmpi slt, %118, %c1_i32_97 : i32
      %120 = arith.extui %119 : i1 to i32
      %c0_i32_98 = arith.constant 0 : i32
      %121 = arith.cmpi ne, %120, %c0_i32_98 : i32
      scf.if %121 {
        %c1_i32_99 = arith.constant 1 : i32
        %122 = arith.addi %arg1, %c1_i32_99 : i32
        %c1_i32_100 = arith.constant 1 : i32
        %123 = arith.subi %c1_i32_100, %9 : i32
        %c160_i32_101 = arith.constant 160 : i32
        %124 = arith.muli %122, %c160_i32_101 : i32
        %c0_i32_102 = arith.constant 0 : i32
        %125 = tpu.memref_slice %arg3[%arg0, %124, %c0_i32_102] : memref<1x392x128xbf16, #tpu.memory_space<any>> -> memref<1x232x128xbf16, #tpu.memory_space<any>>
        %126 = tpu.memref_squeeze %125 : memref<1x232x128xbf16, #tpu.memory_space<any>> -> memref<232x128xbf16, #tpu.memory_space<any>>
        %c0_i32_103 = arith.constant 0 : i32
        %c0_i32_104 = arith.constant 0 : i32
        %127 = tpu.memref_slice %arg7[%123, %c0_i32_103, %c0_i32_104] : memref<2x232x128xbf16, #tpu.memory_space<vmem>> -> memref<1x232x128xbf16, #tpu.memory_space<vmem>>
        %128 = tpu.memref_squeeze %127 : memref<1x232x128xbf16, #tpu.memory_space<vmem>> -> memref<232x128xbf16, #tpu.memory_space<vmem>>
        %129 = tpu.memref_slice %arg8[%123] : memref<2x!tpu.dma_semaphore, #tpu.memory_space<semaphore_mem>> -> memref<1x!tpu.dma_semaphore, #tpu.memory_space<semaphore_mem>>
        %130 = tpu.memref_squeeze %129 : memref<1x!tpu.dma_semaphore, #tpu.memory_space<semaphore_mem>> -> memref<!tpu.dma_semaphore, #tpu.memory_space<semaphore_mem>>
        tpu.enqueue_dma source(%126 : memref<232x128xbf16, #tpu.memory_space<any>>) target(%128 : memref<232x128xbf16, #tpu.memory_space<vmem>>) target_semaphore(%130 : memref<!tpu.dma_semaphore, #tpu.memory_space<semaphore_mem>>)
      } else {
      }
    } else {
    }
    %cst = arith.constant 0.000000e+00 : f32
    %18 = vector.broadcast %cst : f32 to vector<160x128xf32>
    %c0 = arith.constant 0 : index
    %c0_8 = arith.constant 0 : index
    %19 = vector.load %arg9[%c0, %c0_8] : memref<160x128xf32, #tpu.memory_space<vmem>>, vector<160x128xf32>
    tpu.vector_store %arg9[%c0, %c0_8], %18 {strides = array<i32>} : memref<160x128xf32, #tpu.memory_space<vmem>>, vector<160x128xf32>,
    %20 = arith.index_cast %9 : i32 to index
    %c0_9 = arith.constant 0 : index
    %c0_10 = arith.constant 0 : index
    %21 = vector.load %arg7[%20, %c0_9, %c0_10] : memref<2x232x128xbf16, #tpu.memory_space<vmem>>, vector<1x160x128xbf16>
    %22 = vector.shape_cast %21 : vector<1x160x128xbf16> to vector<160x128xbf16>
    %c0_11 = arith.constant 0 : index
    %c0_12 = arith.constant 0 : index
    %23 = vector.load %arg9[%c0_11, %c0_12] : memref<160x128xf32, #tpu.memory_space<vmem>>, vector<160x128xf32>
    %c0_13 = arith.constant 0 : index
    %c0_14 = arith.constant 0 : index
    %c0_15 = arith.constant 0 : index
    %24 = vector.load %arg4[%c0_13, %c0_14, %c0_15] : memref<9x128x128xbf16, #tpu.memory_space<vmem>>, vector<1x128x128xbf16>
    %25 = vector.shape_cast %24 : vector<1x128x128xbf16> to vector<128x128xbf16>
    %cst_16 = arith.constant dense<0.000000e+00> : vector<160x128xf32>
    %26 = tpu.matmul %22, %25, %cst_16 {dimension_numbers = #tpu.dot_dimension_numbers<[1], [0], [0], [1], [0, 0, 1, 1], [], []>} : vector<160x128xbf16>, vector<128x128xbf16>, vector<160x128xf32> -> vector<160x128xf32>
    %27 = arith.addf %23, %26 : vector<160x128xf32>
    %c0_17 = arith.constant 0 : index
    %c0_18 = arith.constant 0 : index
    %28 = vector.load %arg9[%c0_17, %c0_18] : memref<160x128xf32, #tpu.memory_space<vmem>>, vector<160x128xf32>
    tpu.vector_store %arg9[%c0_17, %c0_18], %27 {strides = array<i32>} : memref<160x128xf32, #tpu.memory_space<vmem>>, vector<160x128xf32>,
    %29 = arith.index_cast %9 : i32 to index
    %c2 = arith.constant 2 : index
    %c0_19 = arith.constant 0 : index
    %30 = vector.load %arg7[%29, %c2, %c0_19] : memref<2x232x128xbf16, #tpu.memory_space<vmem>>, vector<1x160x128xbf16>
    %31 = vector.shape_cast %30 : vector<1x160x128xbf16> to vector<160x128xbf16>
    %c0_20 = arith.constant 0 : index
    %c0_21 = arith.constant 0 : index
    %32 = vector.load %arg9[%c0_20, %c0_21] : memref<160x128xf32, #tpu.memory_space<vmem>>, vector<160x128xf32>
    %c1 = arith.constant 1 : index
    %c0_22 = arith.constant 0 : index
    %c0_23 = arith.constant 0 : index
    %33 = vector.load %arg4[%c1, %c0_22, %c0_23] : memref<9x128x128xbf16, #tpu.memory_space<vmem>>, vector<1x128x128xbf16>
    %34 = vector.shape_cast %33 : vector<1x128x128xbf16> to vector<128x128xbf16>
    %cst_24 = arith.constant dense<0.000000e+00> : vector<160x128xf32>
    %35 = tpu.matmul %31, %34, %cst_24 {dimension_numbers = #tpu.dot_dimension_numbers<[1], [0], [0], [1], [0, 0, 1, 1], [], []>} : vector<160x128xbf16>, vector<128x128xbf16>, vector<160x128xf32> -> vector<160x128xf32>
    %36 = arith.addf %32, %35 : vector<160x128xf32>
    %c0_25 = arith.constant 0 : index
    %c0_26 = arith.constant 0 : index
    %37 = vector.load %arg9[%c0_25, %c0_26] : memref<160x128xf32, #tpu.memory_space<vmem>>, vector<160x128xf32>
    tpu.vector_store %arg9[%c0_25, %c0_26], %36 {strides = array<i32>} : memref<160x128xf32, #tpu.memory_space<vmem>>, vector<160x128xf32>,
    %38 = arith.index_cast %9 : i32 to index
    %c4 = arith.constant 4 : index
    %c0_27 = arith.constant 0 : index
    %39 = vector.load %arg7[%38, %c4, %c0_27] : memref<2x232x128xbf16, #tpu.memory_space<vmem>>, vector<1x160x128xbf16>
    %40 = vector.shape_cast %39 : vector<1x160x128xbf16> to vector<160x128xbf16>
    %c0_28 = arith.constant 0 : index
    %c0_29 = arith.constant 0 : index
    %41 = vector.load %arg9[%c0_28, %c0_29] : memref<160x128xf32, #tpu.memory_space<vmem>>, vector<160x128xf32>
    %c2_30 = arith.constant 2 : index
    %c0_31 = arith.constant 0 : index
    %c0_32 = arith.constant 0 : index
    %42 = vector.load %arg4[%c2_30, %c0_31, %c0_32] : memref<9x128x128xbf16, #tpu.memory_space<vmem>>, vector<1x128x128xbf16>
    %43 = vector.shape_cast %42 : vector<1x128x128xbf16> to vector<128x128xbf16>
    %cst_33 = arith.constant dense<0.000000e+00> : vector<160x128xf32>
    %44 = tpu.matmul %40, %43, %cst_33 {dimension_numbers = #tpu.dot_dimension_numbers<[1], [0], [0], [1], [0, 0, 1, 1], [], []>} : vector<160x128xbf16>, vector<128x128xbf16>, vector<160x128xf32> -> vector<160x128xf32>
    %45 = arith.addf %41, %44 : vector<160x128xf32>
    %c0_34 = arith.constant 0 : index
    %c0_35 = arith.constant 0 : index
    %46 = vector.load %arg9[%c0_34, %c0_35] : memref<160x128xf32, #tpu.memory_space<vmem>>, vector<160x128xf32>
    tpu.vector_store %arg9[%c0_34, %c0_35], %45 {strides = array<i32>} : memref<160x128xf32, #tpu.memory_space<vmem>>, vector<160x128xf32>,
    %47 = arith.index_cast %9 : i32 to index
    %c32 = arith.constant 32 : index
    %c0_36 = arith.constant 0 : index
    %48 = vector.load %arg7[%47, %c32, %c0_36] : memref<2x232x128xbf16, #tpu.memory_space<vmem>>, vector<1x160x128xbf16>
    %49 = vector.shape_cast %48 : vector<1x160x128xbf16> to vector<160x128xbf16>
    %c0_37 = arith.constant 0 : index
    %c0_38 = arith.constant 0 : index
    %50 = vector.load %arg9[%c0_37, %c0_38] : memref<160x128xf32, #tpu.memory_space<vmem>>, vector<160x128xf32>
    %c3 = arith.constant 3 : index
    %c0_39 = arith.constant 0 : index
    %c0_40 = arith.constant 0 : index
    %51 = vector.load %arg4[%c3, %c0_39, %c0_40] : memref<9x128x128xbf16, #tpu.memory_space<vmem>>, vector<1x128x128xbf16>
    %52 = vector.shape_cast %51 : vector<1x128x128xbf16> to vector<128x128xbf16>
    %cst_41 = arith.constant dense<0.000000e+00> : vector<160x128xf32>
    %53 = tpu.matmul %49, %52, %cst_41 {dimension_numbers = #tpu.dot_dimension_numbers<[1], [0], [0], [1], [0, 0, 1, 1], [], []>} : vector<160x128xbf16>, vector<128x128xbf16>, vector<160x128xf32> -> vector<160x128xf32>
    %54 = arith.addf %50, %53 : vector<160x128xf32>
    %c0_42 = arith.constant 0 : index
    %c0_43 = arith.constant 0 : index
    %55 = vector.load %arg9[%c0_42, %c0_43] : memref<160x128xf32, #tpu.memory_space<vmem>>, vector<160x128xf32>
    tpu.vector_store %arg9[%c0_42, %c0_43], %54 {strides = array<i32>} : memref<160x128xf32, #tpu.memory_space<vmem>>, vector<160x128xf32>,
    %56 = arith.index_cast %9 : i32 to index
    %c34 = arith.constant 34 : index
    %c0_44 = arith.constant 0 : index
    %57 = vector.load %arg7[%56, %c34, %c0_44] : memref<2x232x128xbf16, #tpu.memory_space<vmem>>, vector<1x160x128xbf16>
    %58 = vector.shape_cast %57 : vector<1x160x128xbf16> to vector<160x128xbf16>
    %c0_45 = arith.constant 0 : index
    %c0_46 = arith.constant 0 : index
    %59 = vector.load %arg9[%c0_45, %c0_46] : memref<160x128xf32, #tpu.memory_space<vmem>>, vector<160x128xf32>
    %c4_47 = arith.constant 4 : index
    %c0_48 = arith.constant 0 : index
    %c0_49 = arith.constant 0 : index
    %60 = vector.load %arg4[%c4_47, %c0_48, %c0_49] : memref<9x128x128xbf16, #tpu.memory_space<vmem>>, vector<1x128x128xbf16>
    %61 = vector.shape_cast %60 : vector<1x128x128xbf16> to vector<128x128xbf16>
    %cst_50 = arith.constant dense<0.000000e+00> : vector<160x128xf32>
    %62 = tpu.matmul %58, %61, %cst_50 {dimension_numbers = #tpu.dot_dimension_numbers<[1], [0], [0], [1], [0, 0, 1, 1], [], []>} : vector<160x128xbf16>, vector<128x128xbf16>, vector<160x128xf32> -> vector<160x128xf32>
    %63 = arith.addf %59, %62 : vector<160x128xf32>
    %c0_51 = arith.constant 0 : index
    %c0_52 = arith.constant 0 : index
    %64 = vector.load %arg9[%c0_51, %c0_52] : memref<160x128xf32, #tpu.memory_space<vmem>>, vector<160x128xf32>
    tpu.vector_store %arg9[%c0_51, %c0_52], %63 {strides = array<i32>} : memref<160x128xf32, #tpu.memory_space<vmem>>, vector<160x128xf32>,
    %65 = arith.index_cast %9 : i32 to index
    %c36 = arith.constant 36 : index
    %c0_53 = arith.constant 0 : index
    %66 = vector.load %arg7[%65, %c36, %c0_53] : memref<2x232x128xbf16, #tpu.memory_space<vmem>>, vector<1x160x128xbf16>
    %67 = vector.shape_cast %66 : vector<1x160x128xbf16> to vector<160x128xbf16>
    %c0_54 = arith.constant 0 : index
    %c0_55 = arith.constant 0 : index
    %68 = vector.load %arg9[%c0_54, %c0_55] : memref<160x128xf32, #tpu.memory_space<vmem>>, vector<160x128xf32>
    %c5 = arith.constant 5 : index
    %c0_56 = arith.constant 0 : index
    %c0_57 = arith.constant 0 : index
    %69 = vector.load %arg4[%c5, %c0_56, %c0_57] : memref<9x128x128xbf16, #tpu.memory_space<vmem>>, vector<1x128x128xbf16>
    %70 = vector.shape_cast %69 : vector<1x128x128xbf16> to vector<128x128xbf16>
    %cst_58 = arith.constant dense<0.000000e+00> : vector<160x128xf32>
    %71 = tpu.matmul %67, %70, %cst_58 {dimension_numbers = #tpu.dot_dimension_numbers<[1], [0], [0], [1], [0, 0, 1, 1], [], []>} : vector<160x128xbf16>, vector<128x128xbf16>, vector<160x128xf32> -> vector<160x128xf32>
    %72 = arith.addf %68, %71 : vector<160x128xf32>
    %c0_59 = arith.constant 0 : index
    %c0_60 = arith.constant 0 : index
    %73 = vector.load %arg9[%c0_59, %c0_60] : memref<160x128xf32, #tpu.memory_space<vmem>>, vector<160x128xf32>
    tpu.vector_store %arg9[%c0_59, %c0_60], %72 {strides = array<i32>} : memref<160x128xf32, #tpu.memory_space<vmem>>, vector<160x128xf32>,
    %74 = arith.index_cast %9 : i32 to index
    %c64 = arith.constant 64 : index
    %c0_61 = arith.constant 0 : index
    %75 = vector.load %arg7[%74, %c64, %c0_61] : memref<2x232x128xbf16, #tpu.memory_space<vmem>>, vector<1x160x128xbf16>
    %76 = vector.shape_cast %75 : vector<1x160x128xbf16> to vector<160x128xbf16>
    %c0_62 = arith.constant 0 : index
    %c0_63 = arith.constant 0 : index
    %77 = vector.load %arg9[%c0_62, %c0_63] : memref<160x128xf32, #tpu.memory_space<vmem>>, vector<160x128xf32>
    %c6 = arith.constant 6 : index
    %c0_64 = arith.constant 0 : index
    %c0_65 = arith.constant 0 : index
    %78 = vector.load %arg4[%c6, %c0_64, %c0_65] : memref<9x128x128xbf16, #tpu.memory_space<vmem>>, vector<1x128x128xbf16>
    %79 = vector.shape_cast %78 : vector<1x128x128xbf16> to vector<128x128xbf16>
    %cst_66 = arith.constant dense<0.000000e+00> : vector<160x128xf32>
    %80 = tpu.matmul %76, %79, %cst_66 {dimension_numbers = #tpu.dot_dimension_numbers<[1], [0], [0], [1], [0, 0, 1, 1], [], []>} : vector<160x128xbf16>, vector<128x128xbf16>, vector<160x128xf32> -> vector<160x128xf32>
    %81 = arith.addf %77, %80 : vector<160x128xf32>
    %c0_67 = arith.constant 0 : index
    %c0_68 = arith.constant 0 : index
    %82 = vector.load %arg9[%c0_67, %c0_68] : memref<160x128xf32, #tpu.memory_space<vmem>>, vector<160x128xf32>
    tpu.vector_store %arg9[%c0_67, %c0_68], %81 {strides = array<i32>} : memref<160x128xf32, #tpu.memory_space<vmem>>, vector<160x128xf32>,
    %83 = arith.index_cast %9 : i32 to index
    %c66 = arith.constant 66 : index
    %c0_69 = arith.constant 0 : index
    %84 = vector.load %arg7[%83, %c66, %c0_69] : memref<2x232x128xbf16, #tpu.memory_space<vmem>>, vector<1x160x128xbf16>
    %85 = vector.shape_cast %84 : vector<1x160x128xbf16> to vector<160x128xbf16>
    %c0_70 = arith.constant 0 : index
    %c0_71 = arith.constant 0 : index
    %86 = vector.load %arg9[%c0_70, %c0_71] : memref<160x128xf32, #tpu.memory_space<vmem>>, vector<160x128xf32>
    %c7 = arith.constant 7 : index
    %c0_72 = arith.constant 0 : index
    %c0_73 = arith.constant 0 : index
    %87 = vector.load %arg4[%c7, %c0_72, %c0_73] : memref<9x128x128xbf16, #tpu.memory_space<vmem>>, vector<1x128x128xbf16>
    %88 = vector.shape_cast %87 : vector<1x128x128xbf16> to vector<128x128xbf16>
    %cst_74 = arith.constant dense<0.000000e+00> : vector<160x128xf32>
    %89 = tpu.matmul %85, %88, %cst_74 {dimension_numbers = #tpu.dot_dimension_numbers<[1], [0], [0], [1], [0, 0, 1, 1], [], []>} : vector<160x128xbf16>, vector<128x128xbf16>, vector<160x128xf32> -> vector<160x128xf32>
    %90 = arith.addf %86, %89 : vector<160x128xf32>
    %c0_75 = arith.constant 0 : index
    %c0_76 = arith.constant 0 : index
    %91 = vector.load %arg9[%c0_75, %c0_76] : memref<160x128xf32, #tpu.memory_space<vmem>>, vector<160x128xf32>
    tpu.vector_store %arg9[%c0_75, %c0_76], %90 {strides = array<i32>} : memref<160x128xf32, #tpu.memory_space<vmem>>, vector<160x128xf32>,
    %92 = arith.index_cast %9 : i32 to index
    %c68 = arith.constant 68 : index
    %c0_77 = arith.constant 0 : index
    %93 = vector.load %arg7[%92, %c68, %c0_77] : memref<2x232x128xbf16, #tpu.memory_space<vmem>>, vector<1x160x128xbf16>
    %94 = vector.shape_cast %93 : vector<1x160x128xbf16> to vector<160x128xbf16>
    %c0_78 = arith.constant 0 : index
    %c0_79 = arith.constant 0 : index
    %95 = vector.load %arg9[%c0_78, %c0_79] : memref<160x128xf32, #tpu.memory_space<vmem>>, vector<160x128xf32>
    %c8 = arith.constant 8 : index
    %c0_80 = arith.constant 0 : index
    %c0_81 = arith.constant 0 : index
    %96 = vector.load %arg4[%c8, %c0_80, %c0_81] : memref<9x128x128xbf16, #tpu.memory_space<vmem>>, vector<1x128x128xbf16>
    %97 = vector.shape_cast %96 : vector<1x128x128xbf16> to vector<128x128xbf16>
    %cst_82 = arith.constant dense<0.000000e+00> : vector<160x128xf32>
    %98 = tpu.matmul %94, %97, %cst_82 {dimension_numbers = #tpu.dot_dimension_numbers<[1], [0], [0], [1], [0, 0, 1, 1], [], []>} : vector<160x128xbf16>, vector<128x128xbf16>, vector<160x128xf32> -> vector<160x128xf32>
    %99 = arith.addf %95, %98 : vector<160x128xf32>
    %c0_83 = arith.constant 0 : index
    %c0_84 = arith.constant 0 : index
    %100 = vector.load %arg9[%c0_83, %c0_84] : memref<160x128xf32, #tpu.memory_space<vmem>>, vector<160x128xf32>
    tpu.vector_store %arg9[%c0_83, %c0_84], %99 {strides = array<i32>} : memref<160x128xf32, #tpu.memory_space<vmem>>, vector<160x128xf32>,
    %c0_85 = arith.constant 0 : index
    %c0_86 = arith.constant 0 : index
    %101 = vector.load %arg9[%c0_85, %c0_86] : memref<160x128xf32, #tpu.memory_space<vmem>>, vector<160x128xf32>
    %c0_87 = arith.constant 0 : index
    %c0_88 = arith.constant 0 : index
    %102 = vector.load %arg5[%c0_87, %c0_88] : memref<1x128xf32, #tpu.memory_space<vmem>>, vector<1x128xf32>
    %103 = vector.broadcast %102 : vector<1x128xf32> to vector<160x128xf32>
    %104 = arith.addf %101, %103 : vector<160x128xf32>
    %cst_89 = arith.constant 0.000000e+00 : f32
    %105 = vector.broadcast %cst_89 : f32 to vector<160x128xf32>
    %106 = arith.maximumf %104, %105 : vector<160x128xf32>
    %107 = arith.truncf %106 : vector<160x128xf32> to vector<160x128xbf16>
    %c0_90 = arith.constant 0 : index
    %c0_91 = arith.constant 0 : index
    %c0_92 = arith.constant 0 : index
    %108 = vector.load %arg6[%c0_90, %c0_91, %c0_92] : memref<1x160x128xbf16, #tpu.memory_space<vmem>>, vector<1x160x128xbf16>
    %109 = vector.shape_cast %108 : vector<1x160x128xbf16> to vector<160x128xbf16>
    %110 = vector.shape_cast %107 : vector<160x128xbf16> to vector<1x160x128xbf16>
    tpu.vector_store %arg6[%c0_90, %c0_91, %c0_92], %110 {strides = array<i32>} : memref<1x160x128xbf16, #tpu.memory_space<vmem>>, vector<1x160x128xbf16>,
    return
  }
  func.func @transform_1(%arg0: i32, %arg1: i32, %arg2: i32) -> (i32, i32, i32) {
    %c0_i32 = arith.constant 0 : i32
    %c0_i32_0 = arith.constant 0 : i32
    %c0_i32_1 = arith.constant 0 : i32
    return %c0_i32, %c0_i32_0, %arg2 : i32, i32, i32
  }
  func.func @transform_2(%arg0: i32, %arg1: i32, %arg2: i32) -> (i32, i32) {
    %c0_i32 = arith.constant 0 : i32
    %c0_i32_0 = arith.constant 0 : i32
    return %c0_i32, %arg2 : i32, i32
  }
  func.func @transform_3(%arg0: i32, %arg1: i32, %arg2: i32) -> (i32, i32, i32) {
    %c0_i32 = arith.constant 0 : i32
    return %arg0, %arg1, %arg2 : i32, i32, i32
  }
}

</mosaic_0001>

<bundles_post_ra>
// kernel: tpu_custom_call.1
= control target key start
LH: loop header
LB: loop body
LE: loop exit
PB: predicated region body
PF: predicated region fallthrough
CT: control target
= control target key end

     0   :  { %8 = vsyncpa [#allocation6], 0  ;;  %s4689_s0 = inlined_call_operand.hbm [shape: bf16[1,392,128], index: 0, kind: input, shape index: {}]   ;;  %s4690_s1 = inlined_call_operand.hbm [shape: bf16[9,128,128], index: 1, kind: input, shape index: {}]   ;;  %s4691_s2 = inlined_call_operand.vmem [shape: f32[1,128], index: 2, kind: input, shape index: {}]   ;;  %s4692_s3 = inlined_call_operand.hbm [shape: bf16[1,160,128], index: 3, kind: output, shape index: {}]  }
   0x1   :  { %9 = vsyncpa [#allocation7], 0  ;;  %s4510_s12 = smov [#allocation5]   ;;  %s4438_s16 = scalar_lea.hbm %s4690_s1, 9216 }
   0x2   :  { %s15_s13 = sshll.u32 %s4510_s12, 4  ;;  %p4439_p0 = scmp.ne.s32.totalorder %s4690_s1, %s4438_s16  ;;  %s16_s13 = int_to_ptr.vmem [resolvable:$true] %s15_s13 }
   0x3   :  { %p4442_p1 = scmp.lt.u32.totalorder %s4438_s16, %s4690_s1 }
   0x5   :  { %p4444_p2 = pnand %p4442_p1, %p4439_p0 }
   0x7   :  { %4447 = shalt.err (!%p4444_p2)
}
   0x8   :  { %s4448_s21 = scalar_lea.vmem %s16_s13, 9216  ;;  %p4453_p4 = scmp.lt.s32.totalorder %s16_s13, %s16_s13 }
   0x9   :  { %p4449_p3 = scmp.ne.s32.totalorder %s16_s13, %s4448_s21  ;;  %p4454_p5 = scmp.lt.s32.totalorder %s4448_s21, %s4448_s21 }
   0xb   :  { %p4455_p6 = por %p4454_p5, %p4453_p4 }
   0xd   :  { %p4456_p7 = pnand %p4455_p6, %p4449_p3 }
   0xf   :  { %4459 = shalt.err (!%p4456_p7)
}
  0x10   :  { %s4511_s22 = smov 64   ;;  %s4512_s23 = smov 4  }
  0x11   :  { %21 = dma.hbm_to_vmem [thread:$0]  %s4690_s1, 9216, %s16_s13, [#allocation6], %s4511_s22, %s4511_s22, %s4512_s23  }
  0x12   :  { %4504 = dma.done.wait [#allocation6], 9216  }
  0x13   :  { %4505 = vsyncadd [#allocation6], 4294958080  ;;  %s4513_s26 = smov [#allocation2]   ;;  %s4460_s30 = scalar_lea.hbm %s4689_s0, 1856 }
  0x14   :  { %s52_s27 = sshll.u32 %s4513_s26, 4  ;;  %p4461_p8 = scmp.ne.s32.totalorder %s4689_s0, %s4460_s30  ;;  %s53_s27 = int_to_ptr.vmem [resolvable:$true] %s52_s27 }
  0x15   :  { %s4462_s8 = scalar_lea.hbm %s4689_s0, 3136  ;;  %p4464_p10 = scmp.lt.u32.totalorder %s4460_s30, %s4689_s0 }
  0x16   :  { %p4463_p9 = scmp.lt.u32.totalorder %s4462_s8, %s4460_s30 }
  0x18   :  { %p4465_p11 = por %p4464_p10, %p4463_p9 }
  0x1a   :  { %p4466_p12 = pnand %p4465_p11, %p4461_p8 }
  0x1c   :  { %4469 = shalt.err (!%p4466_p12)  }
  0x1d   :  { %s4470_s10 = scalar_lea.vmem %s53_s27, 1856  ;;  %s4474_s11 = scalar_lea.vmem %s53_s27, 3712 }
  0x1e   :  { %p4471_p13 = scmp.ne.s32.totalorder %s53_s27, %s4470_s10  ;;  %p4475_p0 = scmp.lt.s32.totalorder %s53_s27, %s53_s27 }
  0x1f   :  { %p4476_p1 = scmp.lt.s32.totalorder %s4474_s11, %s4470_s10 }
  0x21   :  { %p4477_p2 = por %p4476_p1, %p4475_p0 }
  0x23   :  { %p4478_p3 = pnand %p4477_p2, %p4471_p13 }
  0x25   :  { %4481 = shalt.err (!%p4478_p3)  }
  0x26   :  { %55 = dma.hbm_to_vmem [thread:$0]  %s4689_s0, 1856, %s53_s27, [#allocation3] }
  0x27   :  { %4506 = dma.done.wait [#allocation3], 1856 }
  0x28   :  { %4507 = vsyncadd [#allocation3], 4294965440  ;;  %v4270_v0 = vld [vmem:[#allocation5] sm:$0xff]   ;;  %v4272_v2 = vld [vmem:[#allocation5 + $0x8] sm:$0xff]   ;;  %vm543_vm0 = vcmask 1046528   ;;  %vm887_vm1 = vcmask 1045504  }
  0x29   :  { %v4271_v1 = vld [vmem:[#allocation5 + $0x100] sm:$0xff]   ;;  %3765 = vmatprep.subr.bf16.mxu1 %v4270_v0  ;;  %v4273_v3 = vld [vmem:[#allocation5 + $0x108] sm:$0xff]   ;;  %v4274_v4 = vld [vmem:[#allocation5 + $0x10] sm:$0xff]  }
  0x2a   :  { %3909 = vmatprep.subr.bf16.mxu0 %v4271_v1  ;;  %3766 = vmatpush3.bf16.msra.mxu1 %v4270_v0  ;;  %v4275_v5 = vld [vmem:[#allocation5 + $0x110] sm:$0xff]   ;;  %v4276_v6 = vld [vmem:[#allocation5 + $0x18] sm:$0xff]   ;;  %v4278_v8 = vld [vmem:[#allocation5 + $0x20] sm:$0xff]  }
  0x2b   :  { %3910 = vmatpush3.bf16.msra.mxu0 %v4271_v1  ;;  %3767 = vmatprep.subr.bf16.mxu1 %v4272_v2  ;;  %v4277_v7 = vld [vmem:[#allocation5 + $0x118] sm:$0xff]   ;;  %v4279_v9 = vld [vmem:[#allocation5 + $0x120] sm:$0xff]   ;;  %v4280_v10 = vld [vmem:[#allocation5 + $0x28] sm:$0xff]  }
  0x2c   :  { %3911 = vmatprep.subr.bf16.mxu0 %v4273_v3  ;;  %v4281_v11 = vld [vmem:[#allocation5 + $0x128] sm:$0xff]   ;;  %v4286_v12 = vld [vmem:[#allocation2] sm:$0xff]   ;;  %v4288_v14 = vld [vmem:[#allocation2 + $0x18] sm:$0xff]  }
  0x2d   :  { %3781 = vmatprep.mubr.bf16.mxu1 %v4286_v12  ;;  %v4287_v13 = vld [vmem:[#allocation2 + $0x10] sm:$0xfe]   ;;  %v4282_v15 = vld [vmem:[#allocation5 + $0x30] sm:$0xff]   ;;  %v1550_v17 = vrot.slane %v4288_v14, 1  ;;  %v4284_v19 = vld [vmem:[#allocation5 + $0x38] sm:$0xff]  }
  0x2e   :  { %3768 = vmatpush3.bf16.msra.mxu1 %v4272_v2  ;;  %v1549_v16 = vrot.slane %v4287_v13, 1  ;;  %v4283_v18 = vld [vmem:[#allocation5 + $0x130] sm:$0xff]   ;;  %v4285_v21 = vld [vmem:[#allocation5 + $0x138] sm:$0xff]   ;;  %v4294_v23 = vld [vmem:[#allocation2 + $0x28] sm:$0xff]  }
  0x2f   :  { %3912 = vmatpush3.bf16.msra.mxu0 %v4273_v3  ;;  %3769 = vmatprep.subr.bf16.mxu1 %v4274_v4  ;;  %v4290_v22 = vld [vmem:[#allocation2 + $0x20] sm:$0xff]   ;;  %v4296_v25 = vld [vmem:[#allocation5 + $0x40] sm:$0xff]   ;;  %v1554_v27 = vrot.slane %v4294_v23, 1  ;;  %v4292_v29 = vld [vmem:[#allocation5 + $0x148] sm:$0xff]  }
  0x30   :  { %3913 = vmatprep.subr.bf16.mxu0 %v4275_v5  ;;  %v1551_v20 = vsel %vm543_vm0, %v1549_v16, %v1550_v17  ;;  %v1552_v24 = vrot.slane %v4290_v22, 1  ;;  %v4291_v26 = vld [vmem:[#allocation5 + $0x140] sm:$0xff]   ;;  %v4293_v30 = vld [vmem:[#allocation2 + $0x10] sm:$0xff]   ;;  %v4301_v34 = vld [vmem:[#allocation2 + $0x38] sm:$0xff]  }
  0x31   :  { %3925 = vmatprep.mubr.bf16.mxu0 %v1551_v20  ;;  %v4289_v28 = vld [vmem:[#allocation2 + $0x8] sm:$0xff]   ;;  %v4297_v32 = vld [vmem:[#allocation2 + $0x30] sm:$0xff]   ;;  %v4295_v36 = vld [vmem:[#allocation2 + $0x18] sm:$0xff]   ;;  %v1558_v40 = vrot.slane %v4301_v34, 1 }
  0x32   :  { %3770 = vmatpush3.bf16.msra.mxu1 %v4274_v4  ;;  %v1553_v31 = vsel %vm543_vm0, %v1550_v17, %v1552_v24  ;;  %v1555_v33 = vsel %vm543_vm0, %v1552_v24, %v1554_v27  ;;  %v4299_v35 = vld [vmem:[#allocation5 + $0x48] sm:$0xff]   ;;  %v1556_v37 = vrot.slane %v4297_v32, 1  ;;  %v4298_v38 = vld [vmem:[#allocation5 + $0x150] sm:$0xff]   ;;  %v4300_v39 = vld [vmem:[#allocation2 + $0x20] sm:$0xff]  }
  0x33   :  { %3914 = vmatpush3.bf16.msra.mxu0 %v4275_v5  ;;  %3771 = vmatprep.subr.bf16.mxu1 %v4276_v6  ;;  %v4304_v41 = vld [vmem:[#allocation5 + $0x50] sm:$0xff]   ;;  %v4302_v42 = vld [vmem:[#allocation5 + $0x158] sm:$0xff]   ;;  %v4309_v46 = vld [vmem:[#allocation2 + $0x48] sm:$0xff]  }
  0x34   :  { %3915 = vmatprep.subr.bf16.mxu0 %v4277_v7  ;;  %v1557_v43 = vsel %vm543_vm0, %v1554_v27, %v1556_v37  ;;  %v4305_v44 = vld [vmem:[#allocation2 + $0x40] sm:$0xff]   ;;  %v1559_v45 = vsel %vm543_vm0, %v1556_v37, %v1558_v40  ;;  %v4303_v48 = vld [vmem:[#allocation2 + $0x28] sm:$0xff]   ;;  %v4308_v51 = vld [vmem:[#allocation2 + $0x30] sm:$0xff]   ;;  %v1562_v52 = vrot.slane %v4309_v46, 1 }
  0x35   :  { %v4306_v47 = vld [vmem:[#allocation5 + $0x58] sm:$0xff]   ;;  %v1560_v49 = vrot.slane %v4305_v44, 1  ;;  %v4307_v50 = vld [vmem:[#allocation5 + $0x160] sm:$0xff]   ;;  %v4312_v54 = vld [vmem:[#allocation2 + $0x50] sm:$0xff]  }
  0x36   :  { %3772 = vmatpush3.bf16.msra.mxu1 %v4276_v6  ;;  %v4311_v53 = vld [vmem:[#allocation5 + $0x60] sm:$0xff]   ;;  %v4313_v56 = vld [vmem:[#allocation5 + $0x168] sm:$0xff]   ;;  %v4317_v58 = vld [vmem:[#allocation2 + $0x58] sm:$0xff]   ;;  %v1564_v62 = vrot.slane %v4312_v54, 1 }
  0x37   :  { %3916 = vmatpush3.bf16.msra.mxu0 %v4277_v7  ;;  %3773 = vmatprep.subr.bf16.mxu1 %v4278_v8  ;;  %v1561_v55 = vsel %vm543_vm0, %v1558_v40, %v1560_v49  ;;  %v1563_v57 = vsel %vm543_vm0, %v1560_v49, %v1562_v52  ;;  %v4314_v59 = vld [vmem:[#allocation5 + $0x68] sm:$0xff]   ;;  %v4315_v60 = vld [vmem:[#allocation5 + $0x170] sm:$0xff]   ;;  %v4320_v0 = vld [vmem:[#allocation2 + $0x60] ss:$0 sps:$4 sm:$0x11]   ;;  %v1566_v2 = vrot.slane %v4317_v58, 1 }
  0x38   :  { %3917 = vmatprep.subr.bf16.mxu0 %v4279_v9  ;;  %v4310_v61 = vld [vmem:[#allocation2 + $0x38] sm:$0xff]   ;;  %v4316_v1 = vld [vmem:[#allocation2 + $0x40] sm:$0xff]   ;;  %v4324_v3 = vld [vmem:[#allocation2 + $0x8] sm:$0xff]   ;;  %v1565_v6 = vsel %vm543_vm0, %v1562_v52, %v1564_v62 }
  0x39   :  { %v4319_v63 = vld [vmem:[#allocation5 + $0x70] sm:$0xff]   ;;  %v4323_v4 = vld [vmem:[#allocation2] sm:$0xfe]   ;;  %v545_v12 = vrot.slane %v4324_v3, 1  ;;  %v4327_v17 = vld [vmem:[#allocation2 + $0x10] sm:$0xff]  }
  0x3a   :  { %3774 = vmatpush3.bf16.msra.mxu1 %v4278_v8  ;;  %v4326_v5 = vld [vmem:[#allocation2 + $0x18] sm:$0xff]   ;;  %v4321_v7 = vld [vmem:[#allocation5 + $0x178] sm:$0xff]   ;;  %v1567_v8 = vsel %vm543_vm0, %v1564_v62, %v1566_v2  ;;  %v544_v13 = vrot.slane %v4323_v4, 1  ;;  %v4332_v23 = vld [vmem:[#allocation2 + $0x28] sm:$0xff]  }
  0x3b   :  { %3918 = vmatpush3.bf16.msra.mxu0 %v4279_v9  ;;  %3775 = vmatprep.subr.bf16.mxu1 %v4280_v10  ;;  %v4322_v9 = vld [vmem:[#allocation5 + $0x78] sm:$0xff]   ;;  %v1893_v14 = vrot.slane %v4326_v5, 2  ;;  %v4331_v20 = vld [vmem:[#allocation2 + $0x18] sm:$0xff]   ;;  %v4330_v32 = vld [vmem:[#allocation5 + $0x188] sm:$0xff]  }
  0x3c   :  { %3919 = vmatprep.subr.bf16.mxu0 %v4281_v11  ;;  %v546_v22 = vsel %vm543_vm0, %v544_v13, %v545_v12  ;;  %v4342_v46 = vld [vmem:[#allocation5 + $0x90] sm:$0xff]   ;;  %v4343_v49 = vld [vmem:[#allocation2 + $0x40] sm:$0xff]   ;;  %v4347_v54 = vld [vmem:[#allocation2 + $0x48] sm:$0xff]  }
  0x3d   :  { %v4346_v52 = vld [vmem:[#allocation2 + $0x38] sm:$0xff]   ;;  %v4349_v62 = vld [vmem:[#allocation5 + $0xa0] sm:$0xff]   ;;  %v4351_v5 = vld [vmem:[#allocation5 + $0x1a8] sm:$0xff]  }
  0x3e   :  { %3776 = vmatpush3.bf16.msra.mxu1 %v4280_v10  ;;  %v4325_v10 = vld [vmem:[#allocation2 + $0x10] sm:$0xfc]   ;;  %v557_v58 = vrot.slane %v4346_v52, 1  ;;  %v4354_v3 = vld [vmem:[#allocation2 + $0x48] sm:$0xff]  }
  0x3f   :  { %3920 = vmatpush3.bf16.msra.mxu0 %v4281_v11  ;;  %3777 = vmatprep.subr.bf16.mxu1 %v4282_v15  ;;  %v1568_v11 = vrot.slane %v4320_v0, 1  ;;  %v1892_v16 = vrot.slane %v4325_v10, 2  ;;  %v4350_v0 = vld [vmem:[#allocation2 + $0x50] sm:$0xff]   ;;  %v561_v10 = vrot.slane %v4354_v3, 1 }
  0x40   :  { %3921 = vmatprep.subr.bf16.mxu0 %v4283_v18  ;;  %v4356_v13 = vld [vmem:[#allocation2 + $0x50] ss:$0 sps:$4 sm:$0x11]  }
  0x41   :  { %v1894_v24 = vsel %vm887_vm1, %v1892_v16, %v1893_v14 }
  0x42   :  { %3778 = vmatpush3.bf16.msra.mxu1 %v4282_v15  ;;  %v4318_v15 = vld [vmem:[#allocation2 + $0x48] sm:$0xff]  }
  0x43   :  { %3922 = vmatpush3.bf16.msra.mxu0 %v4283_v18  ;;  %3779 = vmatprep.subr.bf16.mxu1 %v4284_v19  ;;  %v4329_v18 = vld [vmem:[#allocation5 + $0x180] sm:$0xff]  }
  0x44   :  { %3923 = vmatprep.subr.bf16.mxu0 %v4285_v21 }
  0x46   :  { %3780 = vmatpush3.bf16.msra.mxu1 %v4284_v19  ;;  %v4328_v19 = vld [vmem:[#allocation2 + $0x20] sm:$0xff]  }
  0x47   :  { %3924 = vmatpush3.bf16.msra.mxu0 %v4285_v21  ;;  %3801 = vmatprep.subr.bf16.mxu1 %v4296_v25  ;;  %v1569_v21 = vsel %vm543_vm0, %v1566_v2, %v1568_v11  ;;  %v1895_v27 = vrot.slane %v4328_v19, 2  ;;  %v4353_v11 = vld [vmem:[#allocation5 + $0x1b0] sm:$0xff]  }
  0x48   :  { %3945 = vmatprep.subr.bf16.mxu0 %v4291_v26 }
  0x49   :  { %3782 = vmatmul.mubr.bf16.vlgmr.msra.gmra.mrb[0].mxu1 %v4289_v28  ;;  %v549_v28 = vrot.slane %v4331_v20, 1  ;;  %v1896_v34 = vsel %vm887_vm1, %v1893_v14, %v1895_v27  ;;  %v4358_v14 = vld [vmem:[#allocation2 + $0x60] ss:$0 sps:$4 sm:$0x33]   ;;  %v4361_v20 = vld [vmem:[#allocation2] sm:$0xfc]  }
  0x4a   :  { %3926 = vmatmul.mubr.bf16.vlgmr.msra.gmra.mrb[0].mxu0 %v1553_v31  ;;  %3785 = vmatprep.mubr.bf16.mxu1 %v4293_v30  ;;  %v4333_v30 = vld [vmem:[#allocation2 + $0x20] sm:$0xff]  }
  0x4b   :  { %3946 = vmatpush3.bf16.msra.mxu0 %v4291_v26  ;;  %3929 = vmatprep.mubr.bf16.mxu0 %v1555_v33  ;;  %v547_v26 = vrot.slane %v4327_v17, 1  ;;  %v4335_v33 = vld [vmem:[#allocation2 + $0x30] sm:$0xff]   ;;  %v551_v40 = vrot.slane %v4333_v30, 1  ;;  %v4362_v17 = vld [vmem:[#allocation2 + $0x8] sm:$0xff]  }
  0x4c   :  { %3947 = vmatprep.subr.bf16.mxu0 %v4292_v29  ;;  %3802 = vmatpush3.bf16.msra.mxu1 %v4296_v25  ;;  %v4334_v25 = vld [vmem:[#allocation5 + $0x80] sm:$0xff]  }
  0x4d   :  { %3803 = vmatprep.subr.bf16.mxu1 %v4299_v35  ;;  %v548_v31 = vsel %vm543_vm0, %v545_v12, %v547_v26  ;;  %v4371_v30 = vld [vmem:[#allocation5 + $0xc0] sm:$0xff]  }
  0x4f   :  { %3948 = vmatpush3.bf16.msra.mxu0 %v4292_v29  ;;  %v1897_v29 = vrot.slane %v4332_v23, 2  ;;  %v4360_v23 = vld [vmem:[#allocation5 + $0xb8] sm:$0xff]  }
  0x50   :  { %3949 = vmatprep.subr.bf16.mxu0 %v4298_v38  ;;  %3804 = vmatpush3.bf16.msra.mxu1 %v4299_v35  ;;  %v550_v35 = vsel %vm543_vm0, %v547_v26, %v549_v28  ;;  %v888_v26 = vrot.slane %v4361_v20, 2 }
  0x51   :  { %3786 = vmatmul.mubr.bf16.gmra.mrb[4].mxu1 %v4295_v36  ;;  %3805 = vmatprep.subr.bf16.mxu1 %v4304_v41  ;;  %v4338_v36 = vld [vmem:[#allocation2 + $0x28] sm:$0xff]   ;;  %v1898_v37 = vsel %vm887_vm1, %v1895_v27, %v1897_v29  ;;  %v889_v27 = vrot.slane %v4362_v17, 2 }
  0x52   :  { %3930 = vmatmul.mubr.bf16.gmra.mrb[4].mxu0 %v1557_v43  ;;  %3789 = vmatprep.mubr.bf16.mxu1 %v4300_v39  ;;  %v4337_v39 = vld [vmem:[#allocation5 + $0x88] sm:$0xff]   ;;  %v553_v43 = vrot.slane %v4338_v36, 1  ;;  %v4400_v17 = vld [vmem:[#allocation2 + $0x28] sm:$0xff]  }
  0x53   :  { %3950 = vmatpush3.bf16.msra.mxu0 %v4298_v38  ;;  %3933 = vmatprep.mubr.bf16.mxu0 %v1559_v45  ;;  %v4339_v38 = vld [vmem:[#allocation2 + $0x38] sm:$0xff]   ;;  %v4341_v45 = vld [vmem:[#allocation2 + $0x30] sm:$0xff]  }
  0x54   :  { %3951 = vmatprep.subr.bf16.mxu0 %v4302_v42  ;;  %3806 = vmatpush3.bf16.msra.mxu1 %v4304_v41  ;;  %v4336_v41 = vld [vmem:[#allocation5 + $0x190] sm:$0xff]   ;;  %v1901_v44 = vrot.slane %v4339_v38, 2  ;;  %v4365_v38 = vld [vmem:[#allocation2 + $0x28] sm:$0xff]  }
  0x55   :  { %3807 = vmatprep.subr.bf16.mxu1 %v4306_v47 }
  0x57   :  { %3952 = vmatpush3.bf16.msra.mxu0 %v4302_v42  ;;  %v1899_v42 = vrot.slane %v4335_v33, 2 }
  0x58   :  { %3953 = vmatprep.subr.bf16.mxu0 %v4307_v50  ;;  %3808 = vmatpush3.bf16.msra.mxu1 %v4306_v47  ;;  %v552_v47 = vsel %vm543_vm0, %v549_v28, %v551_v40  ;;  %v4366_v28 = vld [vmem:[#allocation5 + $0x1c0] sm:$0xff]  }
  0x59   :  { %3790 = vmatmul.mubr.bf16.gmra.mrb[8].mxu1 %v4303_v48  ;;  %3809 = vmatprep.subr.bf16.mxu1 %v4311_v53  ;;  %v4340_v48 = vld [vmem:[#allocation5 + $0x198] sm:$0xff]  }
  0x5a   :  { %3934 = vmatmul.mubr.bf16.gmra.mrb[8].mxu0 %v1561_v55  ;;  %3793 = vmatprep.mubr.bf16.mxu1 %v4308_v51  ;;  %v554_v51 = vsel %vm543_vm0, %v551_v40, %v553_v43  ;;  %v4344_v55 = vld [vmem:[#allocation5 + $0x98] sm:$0xff]  }
  0x5b   :  { %3954 = vmatpush3.bf16.msra.mxu0 %v4307_v50  ;;  %3937 = vmatprep.mubr.bf16.mxu0 %v1563_v57  ;;  %v1900_v50 = vsel %vm887_vm1, %v1897_v29, %v1899_v42  ;;  %v1903_v57 = vrot.slane %v4343_v49, 2  ;;  %v4363_v29 = vld [vmem:[#allocation2 + $0x20] sm:$0xff]   ;;  %v4373_v49 = vld [vmem:[#allocation5 + $0x1d0] sm:$0xff]  }
  0x5c   :  { %3810 = vmatpush3.bf16.msra.mxu1 %v4311_v53  ;;  %3955 = vmatprep.subr.bf16.mxu0 %v4313_v56  ;;  %v1902_v53 = vsel %vm887_vm1, %v1899_v42, %v1901_v44 }
  0x5d   :  { %3811 = vmatprep.subr.bf16.mxu1 %v4314_v59 }
  0x5f   :  { %3956 = vmatpush3.bf16.msra.mxu0 %v4313_v56  ;;  %v555_v56 = vrot.slane %v4341_v45, 1  ;;  %v4374_v45 = vld [vmem:[#allocation5 + $0xc8] sm:$0xff]  }
  0x60   :  { %3812 = vmatpush3.bf16.msra.mxu1 %v4314_v59  ;;  %3957 = vmatprep.subr.bf16.mxu0 %v4315_v60  ;;  %v4345_v59 = vld [vmem:[#allocation5 + $0x1a0] sm:$0xff]  }
  0x61   :  { %3794 = vmatmul.mubr.bf16.gmra.mrb[12].mxu1 %v4310_v61  ;;  %3813 = vmatprep.subr.bf16.mxu1 %v4319_v63  ;;  %v4348_v61 = vld [vmem:[#allocation2 + $0x40] sm:$0xff]   ;;  %v558_v2 = vsel %vm543_vm0, %v555_v56, %v557_v58 }
  0x62   :  { %3938 = vmatmul.mubr.bf16.gmra.mrb[12].mxu0 %v1565_v6  ;;  %3797 = vmatprep.mubr.bf16.mxu1 %v4316_v1  ;;  %v1904_v1 = vsel %vm887_vm1, %v1901_v44, %v1903_v57  ;;  %v4355_v6 = vld [vmem:[#allocation2 + $0x58] sm:$0xff]   ;;  %v4367_v44 = vld [vmem:[#allocation5 + $0x1c8] sm:$0xff]  }
  0x63   :  { %3941 = vmatprep.mubr.bf16.mxu0 %v1567_v8  ;;  %3958 = vmatpush3.bf16.msra.mxu0 %v4315_v60  ;;  %v1905_v60 = vrot.slane %v4347_v54, 2  ;;  %v559_v8 = vrot.slane %v4348_v61, 1  ;;  %v1909_v12 = vrot.slane %v4355_v6, 2  ;;  %v4380_v61 = vld [vmem:[#allocation2 + $0x48] sm:$0xff]  }
  0x64   :  { %3814 = vmatpush3.bf16.msra.mxu1 %v4319_v63  ;;  %3959 = vmatprep.subr.bf16.mxu0 %v4321_v7  ;;  %v556_v63 = vsel %vm543_vm0, %v553_v43, %v555_v56  ;;  %v4375_v43 = vld [vmem:[#allocation2 + $0x28] sm:$0xff]   ;;  %v4377_v56 = vld [vmem:[#allocation5 + $0x1d8] sm:$0xff]  }
  0x65   :  { %3815 = vmatprep.subr.bf16.mxu1 %v4322_v9  ;;  %v1906_v4 = vsel %vm887_vm1, %v1903_v57, %v1905_v60  ;;  %v560_v16 = vsel %vm543_vm0, %v557_v58, %v559_v8  ;;  %v562_v19 = vsel %vm543_vm0, %v559_v8, %v561_v10  ;;  %v4381_v57 = vld [vmem:[#allocation5 + $0xd8] sm:$0xff]   ;;  %v4387_v8 = vld [vmem:[#allocation2 + $0x58] sm:$0xff]  }
  0x67   :  { %3960 = vmatpush3.bf16.msra.mxu0 %v4321_v7  ;;  %v4352_v7 = vld [vmem:[#allocation5 + $0xa8] sm:$0xff]  }
  0x68   :  { %3816 = vmatpush3.bf16.msra.mxu1 %v4322_v9  ;;  %3981 = vmatprep.subr.bf16.mxu0 %v4329_v18  ;;  %v1907_v9 = vrot.slane %v4350_v0, 2  ;;  %v4386_v0 = vld [vmem:[#allocation5 + $0xe0] sm:$0xff]  }
  0x69   :  { %3798 = vmatmul.mubr.bf16.gmra.mrb[16].mxu1 %v4318_v15  ;;  %3837 = vmatprep.subr.bf16.mxu1 %v4334_v25  ;;  %v4357_v15 = vld [vmem:[#allocation5 + $0xb0] sm:$0xff]  }
  0x6a   :  { %3942 = vmatmul.mubr.bf16.gmra.mrb[16].mxu0 %v1569_v21  ;;  %3817 = vmatprep.mubr.bf16.mxu1 %v546_v22  ;;  %v1910_v21 = vsel %vm887_vm1, %v1907_v9, %v1909_v12  ;;  %v4359_v22 = vld [vmem:[#allocation5 + $0x1b8] sm:$0xff]  }
  0x6b   :  { %3961 = vmatprep.mubr.bf16.mxu0 %v1894_v24  ;;  %v563_v24 = vrot.slane %v4356_v13, 1 }
  0x71   :  { %3818 = vmatmul.mubr.bf16.vlgmr.msra.gmra.mrb[0].mxu1 %v548_v31  ;;  %v564_v31 = vsel %vm543_vm0, %v561_v10, %v563_v24  ;;  %v4393_v10 = vld [vmem:[#allocation2 + $0x50] ss:$0 sps:$4 sm:$0x33]  }
  0x72   :  { %3962 = vmatmul.mubr.bf16.vlgmr.msra.gmra.mrb[0].mxu0 %v1896_v34  ;;  %3821 = vmatprep.mubr.bf16.mxu1 %v550_v35  ;;  %v890_v34 = vsel %vm887_vm1, %v888_v26, %v889_v27  ;;  %v4368_v35 = vld [vmem:[#allocation2 + $0x18] sm:$0xff]   ;;  %v4402_v26 = vld [vmem:[#allocation2 + $0x30] sm:$0xff]  }
  0x73   :  { %3982 = vmatpush3.bf16.msra.mxu0 %v4329_v18  ;;  %3965 = vmatprep.mubr.bf16.mxu0 %v1898_v37  ;;  %v1908_v18 = vsel %vm887_vm1, %v1905_v60, %v1907_v9  ;;  %v893_v37 = vrot.slane %v4368_v35, 2  ;;  %v4390_v9 = vld [vmem:[#allocation5 + $0x1f0] sm:$0xff]   ;;  %v4408_v35 = vld [vmem:[#allocation2 + $0x40] sm:$0xff]  }
  0x74   :  { %3983 = vmatprep.subr.bf16.mxu0 %v4330_v32  ;;  %3838 = vmatpush3.bf16.msra.mxu1 %v4334_v25  ;;  %v1911_v25 = vrot.slane %v4358_v14, 2  ;;  %v4396_v14 = vld [vmem:[#allocation5 + $0x1f8] sm:$0xff]  }
  0x75   :  { %3839 = vmatprep.subr.bf16.mxu1 %v4337_v39 }
  0x76   :  { %v1912_v33 = vsel %vm887_vm1, %v1909_v12, %v1911_v25  ;;  %v4394_v12 = vld [vmem:[#allocation5 + $0xf0] sm:$0xff]   ;;  %v4398_v25 = vld [vmem:[#allocation2 + $0x10] sm:$0xff]  }
  0x77   :  { %3984 = vmatpush3.bf16.msra.mxu0 %v4330_v32  ;;  %v4364_v32 = vld [vmem:[#allocation2 + $0x10] sm:$0xff]  }
  0x78   :  { %3985 = vmatprep.subr.bf16.mxu0 %v4336_v41  ;;  %3840 = vmatpush3.bf16.msra.mxu1 %v4337_v39  ;;  %v891_v36 = vrot.slane %v4364_v32, 2  ;;  %v4369_v39 = vld [vmem:[#allocation2 + $0x30] sm:$0xff]  }
  0x79   :  { %3822 = vmatmul.mubr.bf16.gmra.mrb[4].mxu1 %v552_v47  ;;  %3841 = vmatprep.subr.bf16.mxu1 %v4342_v46  ;;  %v897_v47 = vrot.slane %v4375_v43, 2  ;;  %v4404_v32 = vld [vmem:[#allocation5 + $0x208] sm:$0xff]   ;;  %v4412_v43 = vld [vmem:[#allocation5 + $0x218] sm:$0xff]  }
  0x7a   :  { %3966 = vmatmul.mubr.bf16.gmra.mrb[4].mxu0 %v1900_v50  ;;  %3825 = vmatprep.mubr.bf16.mxu1 %v554_v51  ;;  %v892_v40 = vsel %vm887_vm1, %v889_v27, %v891_v36  ;;  %v894_v42 = vsel %vm887_vm1, %v891_v36, %v893_v37  ;;  %v4376_v50 = vld [vmem:[#allocation2 + $0x40] sm:$0xff]   ;;  %v4379_v51 = vld [vmem:[#allocation5 + $0xd0] sm:$0xff]  }
  0x7b   :  { %3986 = vmatpush3.bf16.msra.mxu0 %v4336_v41  ;;  %3969 = vmatprep.mubr.bf16.mxu0 %v1902_v53  ;;  %v4370_v41 = vld [vmem:[#allocation2 + $0x20] sm:$0xff]   ;;  %v4378_v53 = vld [vmem:[#allocation2 + $0x30] sm:$0xff]  }
  0x7c   :  { %3987 = vmatprep.subr.bf16.mxu0 %v4340_v48  ;;  %3842 = vmatpush3.bf16.msra.mxu1 %v4342_v46  ;;  %v895_v46 = vrot.slane %v4370_v41, 2  ;;  %v899_v58 = vrot.slane %v4378_v53, 2 }
  0x7d   :  { %3843 = vmatprep.subr.bf16.mxu1 %v4344_v55 }
  0x7e   :  { %v896_v52 = vsel %vm887_vm1, %v893_v37, %v895_v46  ;;  %v898_v54 = vsel %vm887_vm1, %v895_v46, %v897_v47  ;;  %v4411_v37 = vld [vmem:[#allocation2 + $0x48] sm:$0xff]  }
  0x7f   :  { %3988 = vmatpush3.bf16.msra.mxu0 %v4340_v48  ;;  %v4372_v48 = vld [vmem:[#allocation2 + $0x38] sm:$0xff]   ;;  %v2562_v41 = vrot.slane %v4411_v37, 1 }
  0x80   :  { %3989 = vmatprep.subr.bf16.mxu0 %v4345_v59  ;;  %3844 = vmatpush3.bf16.msra.mxu1 %v4344_v55  ;;  %v4383_v55 = vld [vmem:[#allocation2 + $0x38] sm:$0xff]  }
  0x81   :  { %3826 = vmatmul.mubr.bf16.gmra.mrb[8].mxu1 %v556_v63  ;;  %3845 = vmatprep.subr.bf16.mxu1 %v4349_v62  ;;  %v901_v60 = vrot.slane %v4383_v55, 2  ;;  %v4384_v63 = vld [vmem:[#allocation2 + $0x50] sm:$0xff]  }
  0x82   :  { %3970 = vmatmul.mubr.bf16.gmra.mrb[8].mxu0 %v1904_v1  ;;  %3829 = vmatprep.mubr.bf16.mxu1 %v558_v2  ;;  %v900_v1 = vsel %vm887_vm1, %v897_v47, %v899_v58  ;;  %v4388_v2 = vld [vmem:[#allocation5 + $0x1e8] sm:$0xff]   ;;  %v4417_v47 = vld [vmem:[#allocation2 + $0x58] sm:$0xff]  }
  0x83   :  { %3990 = vmatpush3.bf16.msra.mxu0 %v4345_v59  ;;  %3973 = vmatprep.mubr.bf16.mxu0 %v1906_v4  ;;  %v4382_v59 = vld [vmem:[#allocation5 + $0x1e0] sm:$0xff]   ;;  %v902_v3 = vsel %vm887_vm1, %v899_v58, %v901_v60 }
  0x84   :  { %3846 = vmatpush3.bf16.msra.mxu1 %v4349_v62  ;;  %3991 = vmatprep.subr.bf16.mxu0 %v4351_v5  ;;  %v4385_v62 = vld [vmem:[#allocation2 + $0x40] sm:$0xff]   ;;  %v4391_v4 = vld [vmem:[#allocation2 + $0x48] sm:$0xff]  }
  0x85   :  { %3847 = vmatprep.subr.bf16.mxu1 %v4352_v7  ;;  %v903_v6 = vrot.slane %v4385_v62, 2  ;;  %v4422_v62 = vld [vmem:[#allocation2 + $0x50] sm:$0xff]  }
  0x87   :  { %3992 = vmatpush3.bf16.msra.mxu0 %v4351_v5  ;;  %v4389_v5 = vld [vmem:[#allocation5 + $0xe8] sm:$0xff]   ;;  %v904_v13 = vsel %vm887_vm1, %v901_v60, %v903_v6 }
  0x88   :  { %3848 = vmatpush3.bf16.msra.mxu1 %v4352_v7  ;;  %3993 = vmatprep.subr.bf16.mxu0 %v4353_v11  ;;  %v905_v7 = vrot.slane %v4391_v4, 2  ;;  %v4426_v4 = vld [vmem:[#allocation5 + $0x238] sm:$0xff]  }
  0x89   :  { %3830 = vmatmul.mubr.bf16.gmra.mrb[12].mxu1 %v560_v16  ;;  %3849 = vmatprep.subr.bf16.mxu1 %v4357_v15  ;;  %v4399_v16 = vld [vmem:[#allocation2 + $0x20] sm:$0xfe]  }
  0x8a   :  { %3974 = vmatmul.mubr.bf16.gmra.mrb[12].mxu0 %v1908_v18  ;;  %3833 = vmatprep.mubr.bf16.mxu1 %v562_v19  ;;  %v4397_v18 = vld [vmem:[#allocation5 + $0xf8] sm:$0xff]   ;;  %v907_v19 = vrot.slane %v4393_v10, 2  ;;  %v2553_v20 = vrot.slane %v4399_v16, 1  ;;  %v4431_v16 = vld [vmem:[#allocation2 + $0x30] sm:$0xff]  }
  0x8b   :  { %3977 = vmatprep.mubr.bf16.mxu0 %v1910_v21  ;;  %3994 = vmatpush3.bf16.msra.mxu0 %v4353_v11  ;;  %v4392_v11 = vld [vmem:[#allocation2 + $0x60] sm:$0xff]   ;;  %v2554_v21 = vrot.slane %v4400_v17, 1  ;;  %v4434_v17 = vld [vmem:[#allocation2 + $0x68] sm:$0xff]  }
  0x8c   :  { %3850 = vmatpush3.bf16.msra.mxu1 %v4357_v15  ;;  %3995 = vmatprep.subr.bf16.mxu0 %v4359_v22  ;;  %v906_v15 = vsel %vm887_vm1, %v903_v6, %v905_v7  ;;  %v908_v24 = vsel %vm887_vm1, %v905_v7, %v907_v19  ;;  %v4428_v6 = vld [vmem:[#allocation2 + $0x28] sm:$0xff]   ;;  %v4433_v19 = vld [vmem:[#allocation2 + $0x38] sm:$0xff]  }
  0x8d   :  { %3851 = vmatprep.subr.bf16.mxu1 %v4360_v23  ;;  %v2555_v27 = vsel %vm543_vm0, %v2553_v20, %v2554_v21 }
  0x8f   :  { %3996 = vmatpush3.bf16.msra.mxu0 %v4359_v22  ;;  %v4403_v22 = vld [vmem:[#allocation5 + $0x200] sm:$0xff]  }
  0x90   :  { %3852 = vmatpush3.bf16.msra.mxu1 %v4360_v23  ;;  %4017 = vmatprep.subr.bf16.mxu0 %v4366_v28  ;;  %v4395_v23 = vld [vmem:[#allocation2 + $0x68] sm:$0xff]  }
  0x91   :  { %3834 = vmatmul.mubr.bf16.gmra.mrb[16].mxu1 %v564_v31  ;;  %3873 = vmatprep.subr.bf16.mxu1 %v4371_v30  ;;  %v4401_v31 = vld [vmem:[#allocation2 + $0x18] sm:$0xff]  }
  0x92   :  { %3978 = vmatmul.mubr.bf16.gmra.mrb[16].mxu0 %v1912_v33  ;;  %3853 = vmatprep.mubr.bf16.mxu1 %v890_v34  ;;  %v4405_v33 = vld [vmem:[#allocation2 + $0x20] sm:$0xff]  }
  0x93   :  { %3997 = vmatprep.mubr.bf16.mxu0 %v4363_v29  ;;  %v2556_v29 = vrot.slane %v4402_v26, 1 }
  0x95   :  { %v2557_v34 = vsel %vm543_vm0, %v2554_v21, %v2556_v29  ;;  %v2899_v21 = vrot.slane %v4431_v16, 2 }
  0x99   :  { %3854 = vmatmul.mubr.bf16.vlgmr.msra.gmra.mrb[0].mxu1 %v892_v40  ;;  %v4409_v40 = vld [vmem:[#allocation5 + $0x210] sm:$0xff]  }
  0x9a   :  { %3998 = vmatmul.mubr.bf16.vlgmr.msra.gmra.mrb[0].mxu0 %v4365_v38  ;;  %3857 = vmatprep.mubr.bf16.mxu1 %v894_v42  ;;  %v4407_v38 = vld [vmem:[#allocation2 + $0x28] sm:$0xff]   ;;  %v4410_v42 = vld [vmem:[#allocation2 + $0x30] sm:$0xff]  }
  0x9b   :  { %4018 = vmatpush3.bf16.msra.mxu0 %v4366_v28  ;;  %4001 = vmatprep.mubr.bf16.mxu0 %v4369_v39  ;;  %v4406_v28 = vld [vmem:[#allocation2 + $0x38] sm:$0xff]   ;;  %v2560_v39 = vrot.slane %v4408_v35, 1 }
  0x9c   :  { %4019 = vmatprep.subr.bf16.mxu0 %v4367_v44  ;;  %3874 = vmatpush3.bf16.msra.mxu1 %v4371_v30  ;;  %v2558_v30 = vrot.slane %v4406_v28, 1  ;;  %v4435_v28 = vld [vmem:[#allocation2 + $0x40] sm:$0xff]  }
  0x9d   :  { %3875 = vmatprep.subr.bf16.mxu1 %v4374_v45  ;;  %v2563_v46 = vsel %vm543_vm0, %v2560_v39, %v2562_v41 }
  0x9e   :  { %v2559_v36 = vsel %vm543_vm0, %v2556_v29, %v2558_v30 }
  0x9f   :  { %4020 = vmatpush3.bf16.msra.mxu0 %v4367_v44  ;;  %v2561_v44 = vsel %vm543_vm0, %v2558_v30, %v2560_v39  ;;  %v4437_v30 = vld [vmem:[#allocation2 + $0x48] sm:$0xff]  }
  0xa0   :  { %4021 = vmatprep.subr.bf16.mxu0 %v4373_v49  ;;  %3876 = vmatpush3.bf16.msra.mxu1 %v4374_v45  ;;  %v4414_v45 = vld [vmem:[#allocation2 + $0x50] sm:$0xff]  }
  0xa1   :  { %3858 = vmatmul.mubr.bf16.gmra.mrb[4].mxu1 %v896_v52  ;;  %3877 = vmatprep.subr.bf16.mxu1 %v4379_v51  ;;  %v4416_v52 = vld [vmem:[#allocation2 + $0x40] sm:$0xff]  }
  0xa2   :  { %4002 = vmatmul.mubr.bf16.gmra.mrb[4].mxu0 %v4372_v48  ;;  %3861 = vmatprep.mubr.bf16.mxu1 %v898_v54  ;;  %v2564_v48 = vrot.slane %v4414_v45, 1  ;;  %v4419_v54 = vld [vmem:[#allocation2 + $0x60] sm:$0xff]  }
  0xa3   :  { %4022 = vmatpush3.bf16.msra.mxu0 %v4373_v49  ;;  %4005 = vmatprep.mubr.bf16.mxu0 %v4376_v50  ;;  %v4415_v49 = vld [vmem:[#allocation5 + $0x220] sm:$0xff]   ;;  %v2566_v50 = vrot.slane %v4417_v47, 1  ;;  %v2568_v58 = vrot.slane %v4419_v54, 1 }
  0xa4   :  { %4023 = vmatprep.subr.bf16.mxu0 %v4377_v56  ;;  %3878 = vmatpush3.bf16.msra.mxu1 %v4379_v51  ;;  %v4413_v51 = vld [vmem:[#allocation2 + $0x38] sm:$0xff]   ;;  %v2565_v53 = vsel %vm543_vm0, %v2562_v41, %v2564_v48 }
  0xa5   :  { %3879 = vmatprep.subr.bf16.mxu1 %v4381_v57  ;;  %v2567_v55 = vsel %vm543_vm0, %v2564_v48, %v2566_v50 }
  0xa7   :  { %4024 = vmatpush3.bf16.msra.mxu0 %v4377_v56  ;;  %v4420_v56 = vld [vmem:[#allocation5 + $0x228] sm:$0xff]  }
  0xa8   :  { %4025 = vmatprep.subr.bf16.mxu0 %v4382_v59  ;;  %3880 = vmatpush3.bf16.msra.mxu1 %v4381_v57  ;;  %v4423_v57 = vld [vmem:[#allocation2 + $0x68] sm:$0xff]  }
  0xa9   :  { %3862 = vmatmul.mubr.bf16.gmra.mrb[8].mxu1 %v900_v1  ;;  %3881 = vmatprep.subr.bf16.mxu1 %v4386_v0  ;;  %v2570_v60 = vrot.slane %v4423_v57, 1  ;;  %v4429_v1 = vld [vmem:[#allocation2 + $0x50] sm:$0xff]  }
  0xaa   :  { %4006 = vmatmul.mubr.bf16.gmra.mrb[8].mxu0 %v4380_v61  ;;  %3865 = vmatprep.mubr.bf16.mxu1 %v902_v3  ;;  %v4418_v61 = vld [vmem:[#allocation2 + $0x48] sm:$0xff]  }
  0xab   :  { %4026 = vmatpush3.bf16.msra.mxu0 %v4382_v59  ;;  %4009 = vmatprep.mubr.bf16.mxu0 %v4384_v63  ;;  %v4421_v59 = vld [vmem:[#allocation5 + $0x230] sm:$0xff]   ;;  %v2569_v63 = vsel %vm543_vm0, %v2566_v50, %v2568_v58  ;;  %v2571_v3 = vsel %vm543_vm0, %v2568_v58, %v2570_v60 }
  0xac   :  { %3882 = vmatpush3.bf16.msra.mxu1 %v4386_v0  ;;  %4027 = vmatprep.subr.bf16.mxu0 %v4388_v2  ;;  %v4425_v0 = vld [vmem:[#allocation2 + $0x70] ss:$0 sps:$4 sm:$0x11]  }
  0xad   :  { %3883 = vmatprep.subr.bf16.mxu1 %v4389_v5  ;;  %v2572_v7 = vrot.slane %v4425_v0, 1 }
  0xaf   :  { %4028 = vmatpush3.bf16.msra.mxu0 %v4388_v2  ;;  %v4430_v2 = vld [vmem:[#allocation2 + $0x58] sm:$0xff]  }
  0xb0   :  { %3884 = vmatpush3.bf16.msra.mxu1 %v4389_v5  ;;  %4029 = vmatprep.subr.bf16.mxu0 %v4390_v9  ;;  %v4427_v5 = vld [vmem:[#allocation2 + $0x20] sm:$0xfc]  }
  0xb1   :  { %3866 = vmatmul.mubr.bf16.gmra.mrb[12].mxu1 %v904_v13  ;;  %3885 = vmatprep.subr.bf16.mxu1 %v4394_v12  ;;  %v2896_v10 = vrot.slane %v4427_v5, 2  ;;  %v4432_v13 = vld [vmem:[#allocation2 + $0x60] sm:$0xff]  }
  0xb2   :  { %4010 = vmatmul.mubr.bf16.gmra.mrb[12].mxu0 %v4387_v8  ;;  %3869 = vmatprep.mubr.bf16.mxu1 %v906_v15  ;;  %v2907_v8 = vrot.slane %v4429_v1, 2  ;;  %v2911_v20 = vrot.slane %v4432_v13, 2 }
  0xb3   :  { %4013 = vmatprep.mubr.bf16.mxu0 %v4392_v11  ;;  %4030 = vmatpush3.bf16.msra.mxu0 %v4390_v9  ;;  %v2909_v9 = vrot.slane %v4430_v2, 2  ;;  %v2897_v11 = vrot.slane %v4428_v6, 2 }
  0xb4   :  { %3886 = vmatpush3.bf16.msra.mxu1 %v4394_v12  ;;  %4031 = vmatprep.subr.bf16.mxu0 %v4396_v14  ;;  %v4424_v12 = vld [vmem:[#allocation2 + $0x58] sm:$0xff]  }
  0xb5   :  { %3887 = vmatprep.subr.bf16.mxu1 %v4397_v18  ;;  %v2910_v15 = vsel %vm887_vm1, %v2907_v8, %v2909_v9  ;;  %v2900_v26 = vsel %vm887_vm1, %v2897_v11, %v2899_v21 }
  0xb7   :  { %4032 = vmatpush3.bf16.msra.mxu0 %v4396_v14  ;;  %v2573_v14 = vsel %vm543_vm0, %v2570_v60, %v2572_v7 }
  0xb8   :  { %3888 = vmatpush3.bf16.msra.mxu1 %v4397_v18  ;;  %4053 = vmatprep.subr.bf16.mxu0 %v4403_v22  ;;  %v2898_v18 = vsel %vm887_vm1, %v2896_v10, %v2897_v11  ;;  %v4644_v10 = vld [vmem:[%s4691_s2] ss:$0 sm:$0xff]  ;;  %s4514_s2 = smov [#allocation8]  }
  0xb9   :  { %3870 = vmatmul.mubr.bf16.gmra.mrb[16].mxu1 %v908_v24  ;;  %4089 = vmatprep.subr.bf16.mxu1 %v4403_v22  ;;  %v2912_v24 = vsel %vm887_vm1, %v2909_v9, %v2911_v20  ;;  %s3300_s15 = sshll.u32 %s4514_s2, 4  ;;  %s3301_s15 = int_to_ptr.vmem [resolvable:$true] %s3300_s15 }
  0xba   :  { %4014 = vmatmul.mubr.bf16.gmra.mrb[16].mxu0 %v4395_v23  ;;  %3889 = vmatprep.mubr.bf16.mxu1 %v4398_v25  ;;  %v2901_v23 = vrot.slane %v4433_v19, 2  ;;  %v4436_v25 = vld [vmem:[#allocation2 + $0x70] ss:$0 sps:$4 sm:$0x33]   ;;  %s4482_s16 = scalar_lea.vmem %s3301_s15, 1280  ;;  %p4487_p5 = scmp.lt.s32.totalorder %s3301_s15, %s3301_s15 }
  0xbb   :  { %4033 = vmatprep.mubr.bf16.mxu0 %v2555_v27  ;;  %p4483_p4 = scmp.ne.s32.totalorder %s3301_s15, %s4482_s16  ;;  %p4488_p6 = scmp.lt.s32.totalorder %s4482_s16, %s4482_s16 }
  0xbc   :  { %v2902_v29 = vsel %vm887_vm1, %v2899_v21, %v2901_v23 }
  0xbd   :  { %p4489_p7 = por %p4488_p6, %p4487_p5 }
  0xbf   :  { %p4490_p8 = pnand %p4489_p7, %p4483_p4 }
  0xc1   :  { %3890 = vmatmul.mubr.bf16.vlgmr.msra.gmra.mrb[0].mxu1 %v4401_v31  ;;  %v2915_v31 = vrot.slane %v4436_v25, 2 }
  0xc2   :  { %4034 = vmatmul.mubr.bf16.vlgmr.msra.gmra.mrb[0].mxu0 %v2557_v34  ;;  %3893 = vmatprep.mubr.bf16.mxu1 %v4405_v33  ;;  %v2905_v33 = vrot.slane %v4437_v30, 2 }
  0xc3   :  { %4054 = vmatpush3.bf16.msra.mxu0 %v4403_v22  ;;  %4037 = vmatprep.mubr.bf16.mxu0 %v2559_v36 }
  0xc4   :  { %4055 = vmatprep.subr.bf16.mxu0 %v4404_v32  ;;  %4097 = vmatpush3.bf16.msra.mxu1 %v4403_v22  ;;  %v2913_v22 = vrot.slane %v4434_v17, 2  ;;  %v2908_v37 = vsel %vm887_vm1, %v2905_v33, %v2907_v8 }
  0xc5   :  { %4090 = vmatprep.subr.bf16.mxu1 %v4404_v32 }
  0xc6   :  { %v2914_v27 = vsel %vm887_vm1, %v2911_v20, %v2913_v22  ;;  %v2916_v34 = vsel %vm887_vm1, %v2913_v22, %v2915_v31 }
  0xc7   :  { %4056 = vmatpush3.bf16.msra.mxu0 %v4404_v32 }
  0xc8   :  { %4057 = vmatprep.subr.bf16.mxu0 %v4409_v40  ;;  %4098 = vmatpush3.bf16.msra.mxu1 %v4404_v32  ;;  %v2903_v32 = vrot.slane %v4435_v28, 2 }
  0xc9   :  { %3894 = vmatmul.mubr.bf16.gmra.mrb[4].mxu1 %v4407_v38  ;;  %4091 = vmatprep.subr.bf16.mxu1 %v4409_v40 }
  0xca   :  { %4038 = vmatmul.mubr.bf16.gmra.mrb[4].mxu0 %v2561_v44  ;;  %3897 = vmatprep.mubr.bf16.mxu1 %v4410_v42  ;;  %v2904_v35 = vsel %vm887_vm1, %v2901_v23, %v2903_v32  ;;  %v2906_v36 = vsel %vm887_vm1, %v2903_v32, %v2905_v33 }
  0xcb   :  { %4058 = vmatpush3.bf16.msra.mxu0 %v4409_v40  ;;  %4041 = vmatprep.mubr.bf16.mxu0 %v2563_v46 }
  0xcc   :  { %4059 = vmatprep.subr.bf16.mxu0 %v4412_v43  ;;  %4099 = vmatpush3.bf16.msra.mxu1 %v4409_v40 }
  0xcd   :  { %4092 = vmatprep.subr.bf16.mxu1 %v4412_v43 }
  0xcf   :  { %4060 = vmatpush3.bf16.msra.mxu0 %v4412_v43 }
  0xd0   :  { %4061 = vmatprep.subr.bf16.mxu0 %v4415_v49  ;;  %4100 = vmatpush3.bf16.msra.mxu1 %v4412_v43 }
  0xd1   :  { %3898 = vmatmul.mubr.bf16.gmra.mrb[8].mxu1 %v4413_v51  ;;  %4093 = vmatprep.subr.bf16.mxu1 %v4415_v49 }
  0xd2   :  { %4042 = vmatmul.mubr.bf16.gmra.mrb[8].mxu0 %v2565_v53  ;;  %3901 = vmatprep.mubr.bf16.mxu1 %v4416_v52 }
  0xd3   :  { %4062 = vmatpush3.bf16.msra.mxu0 %v4415_v49  ;;  %4045 = vmatprep.mubr.bf16.mxu0 %v2567_v55 }
  0xd4   :  { %4101 = vmatpush3.bf16.msra.mxu1 %v4415_v49  ;;  %4063 = vmatprep.subr.bf16.mxu0 %v4420_v56 }
  0xd5   :  { %4094 = vmatprep.subr.bf16.mxu1 %v4420_v56 }
  0xd7   :  { %4064 = vmatpush3.bf16.msra.mxu0 %v4420_v56 }
  0xd8   :  { %4102 = vmatpush3.bf16.msra.mxu1 %v4420_v56  ;;  %4065 = vmatprep.subr.bf16.mxu0 %v4421_v59 }
  0xd9   :  { %3902 = vmatmul.mubr.bf16.gmra.mrb[12].mxu1 %v4418_v61  ;;  %4095 = vmatprep.subr.bf16.mxu1 %v4421_v59 }
  0xda   :  { %4046 = vmatmul.mubr.bf16.gmra.mrb[12].mxu0 %v2569_v63  ;;  %3905 = vmatprep.mubr.bf16.mxu1 %v4422_v62 }
  0xdb   :  { %4049 = vmatprep.mubr.bf16.mxu0 %v2571_v3  ;;  %4066 = vmatpush3.bf16.msra.mxu0 %v4421_v59 }
  0xdc   :  { %4103 = vmatpush3.bf16.msra.mxu1 %v4421_v59  ;;  %4067 = vmatprep.subr.bf16.mxu0 %v4426_v4 }
  0xdd   :  { %4096 = vmatprep.subr.bf16.mxu1 %v4426_v4 }
  0xdf   :  { %4068 = vmatpush3.bf16.msra.mxu0 %v4426_v4 }
  0xe0   :  { %4104 = vmatpush3.bf16.msra.mxu1 %v4426_v4 }
  0xe1   :  { %3906 = vmatmul.mubr.bf16.gmra.mrb[16].mxu1 %v4424_v12 }
  0xe2   :  { %4050 = vmatmul.mubr.bf16.gmra.mrb[16].mxu0 %v2573_v14  ;;  %4081 = vmatprep.mubr.bf16.mxu1 %v2910_v15 }
  0xe3   :  { %4069 = vmatprep.mubr.bf16.mxu0 %v2898_v18 }
  0xe9   :  { %4082 = vmatmul.mubr.bf16.vlgmr.msra.gmra.mrb[20].mxu1 %v2912_v24 }
  0xea   :  { %4070 = vmatmul.mubr.bf16.vlgmr.msra.gmra.mrb[0].mxu0 %v2900_v26  ;;  %4085 = vmatprep.mubr.bf16.mxu1 %v2914_v27 }
  0xeb   :  { %4073 = vmatprep.mubr.bf16.mxu0 %v2902_v29 }
  0xf1   :  { %4086 = vmatmul.mubr.bf16.gmra.mrb[24].mxu1 %v2916_v34 }
  0xf2   :  { %4074 = vmatmul.mubr.bf16.gmra.mrb[4].mxu0 %v2904_v35 }
  0xf3   :  { %4077 = vmatprep.mubr.bf16.mxu0 %v2906_v36 }
  0xfa   :  { %4078 = vmatmul.mubr.bf16.gmra.mrb[8].mxu0 %v2908_v37 }
 0x194   :  { %v3891_v38 = vpop.f32.mrb[0].mxu1 }
 0x195   :  { %v1319_v39 = vpop.f32.mrb[1].mxu1 }
 0x196   :  { %v3892_v40 = vpop.f32.mrb[2].mxu1 }
 0x197   :  { %v1322_v41 = vpop.f32.mrb[3].mxu1 }
 0x19c   :  { %v4625_v42 = vpop.f32.mrb[4].mxu1 }
 0x19d   :  { %v4627_v43 = vpop.f32.mrb[5].mxu1 }
 0x19e   :  { %v4629_v44 = vpop.f32.mrb[6].mxu1 }
 0x19f   :  { %v4631_v45 = vpop.f32.mrb[7].mxu1 }
 0x1a4   :  { %v4633_v46 = vpop.f32.mrb[8].mxu1 }
 0x1a5   :  { %v4635_v47 = vpop.f32.mrb[9].mxu1 }
 0x1a6   :  { %v4637_v48 = vpop.f32.mrb[10].mxu1 }
 0x1a7   :  { %v4639_v49 = vpop.f32.mrb[11].mxu1 }
 0x1ac   :  { %v3903_v50 = vpop.f32.mrb[12].mxu1 }
 0x1ad   :  { %v4047_v51 = vpop.f32.mrb[12].mxu0  ;;  %v1367_v52 = vpop.f32.mrb[13].mxu1 }
 0x1ae   :  { %v4117_v53 = vadd.f32 %v4047_v51, %v3903_v50  ;;  %v2714_v54 = vpop.f32.mrb[13].mxu0  ;;  %v3904_v55 = vpop.f32.mrb[14].mxu1 }
 0x1af   :  { %v4119_v56 = vadd.f32 %v2714_v54, %v1367_v52  ;;  %v4048_v57 = vpop.f32.mrb[14].mxu0  ;;  %v1370_v58 = vpop.f32.mrb[15].mxu1 }
 0x1b0   :  { %v4121_v59 = vadd.f32 %v4048_v57, %v3904_v55  ;;  %v2717_v60 = vpop.f32.mrb[15].mxu0 }
 0x1b1   :  { %v4123_v61 = vadd.f32 %v2717_v60, %v1370_v58 }
 0x1b4   :  { %v3907_v62 = vpop.f32.mrb[16].mxu1 }
 0x1b5   :  { %v4051_v63 = vpop.f32.mrb[16].mxu0  ;;  %v1383_v0 = vpop.f32.mrb[17].mxu1 }
 0x1b6   :  { %v4125_v1 = vadd.f32 %v4051_v63, %v3907_v62  ;;  %v2730_v2 = vpop.f32.mrb[17].mxu0  ;;  %v3908_v3 = vpop.f32.mrb[18].mxu1 }
 0x1b7   :  { %v4127_v4 = vadd.f32 %v2730_v2, %v1383_v0  ;;  %v4052_v5 = vpop.f32.mrb[18].mxu0  ;;  %v1386_v6 = vpop.f32.mrb[19].mxu1 }
 0x1b8   :  { %v4129_v7 = vadd.f32 %v4052_v5, %v3908_v3  ;;  %v2733_v8 = vpop.f32.mrb[19].mxu0 }
 0x1b9   :  { %v4131_v9 = vadd.f32 %v2733_v8, %v1386_v6 }
 0x1bc   :  { %v4083_v11 = vpop.f32.mrb[20].mxu1 }
 0x1bd   :  { %v4071_v12 = vpop.f32.mrb[0].mxu0  ;;  %v4118_v13 = vadd.f32 %v4117_v53, %v4083_v11  ;;  %v3057_v14 = vpop.f32.mrb[21].mxu1 }
 0x1be   :  { %v4105_v15 = vadd.f32 %v4071_v12, %v3891_v38  ;;  %v3009_v16 = vpop.f32.mrb[1].mxu0  ;;  %v4120_v17 = vadd.f32 %v4119_v56, %v3057_v14  ;;  %v4084_v18 = vpop.f32.mrb[22].mxu1 }
 0x1bf   :  { %v3169_v19 = vadd.f32 %v4118_v13, %v4644_v10  ;;  %v4106_v20 = vadd.f32 %v3009_v16, %v1319_v39  ;;  %v4072_v21 = vpop.f32.mrb[2].mxu0  ;;  %v4122_v22 = vadd.f32 %v4121_v59, %v4084_v18  ;;  %v3060_v23 = vpop.f32.mrb[23].mxu1 }
 0x1c0   :  { %v3157_v24 = vadd.f32 %v4105_v15, %v4644_v10  ;;  %v3167_v25 = vadd.f32 %v4120_v17, %v4644_v10  ;;  %v4107_v26 = vadd.f32 %v4072_v21, %v3892_v40  ;;  %v3012_v27 = vpop.f32.mrb[3].mxu0  ;;  %v4124_v28 = vadd.f32 %v4123_v61, %v3060_v23 }
 0x1c1   :  { %v3155_v29 = vadd.f32 %v4106_v20, %v4644_v10  ;;  %v3170_v30 = vadd.f32 %v4122_v22, %v4644_v10  ;;  %v4108_v31 = vadd.f32 %v3012_v27, %v1322_v41  ;;  %v3189_v34 = vmax.f32 %v3169_v19, 0.0 }
 0x1c2   :  { %v3158_v32 = vadd.f32 %v4107_v26, %v4644_v10  ;;  %v3168_v33 = vadd.f32 %v4124_v28, %v4644_v10  ;;  %v3177_v37 = vmax.f32 %v3157_v24, 0.0  ;;  %v3187_v38 = vmax.f32 %v3167_v25, 0.0 }
 0x1c3   :  { %v3190_v35 = vmax.f32 %v3170_v30, 0.0  ;;  %v3156_v36 = vadd.f32 %v4108_v31, %v4644_v10  ;;  %v3175_v51 = vmax.f32 %v3155_v29, 0.0 }
 0x1c4   :  { %v3178_v39 = vmax.f32 %v3158_v32, 0.0  ;;  %v3188_v50 = vmax.f32 %v3168_v33, 0.0  ;;  %v4087_v40 = vpop.f32.mrb[24].mxu1 }
 0x1c5   :  { %v3582_v52 = vpack.c.bf16 %v3190_v35, %v3189_v34  ;;  %v3176_v53 = vmax.f32 %v3156_v36, 0.0  ;;  %v4075_v54 = vpop.f32.mrb[4].mxu0  ;;  %v4126_v55 = vadd.f32 %v4125_v1, %v4087_v40  ;;  %v3073_v56 = vpop.f32.mrb[25].mxu1 }
 0x1c6   :  { %v3552_v41 = vpack.c.bf16 %v3178_v39, %v3177_v37  ;;  %v3577_v57 = vpack.c.bf16 %v3188_v50, %v3187_v38  ;;  %v4109_v58 = vadd.f32 %v4075_v54, %v4625_v42  ;;  %v3025_v59 = vpop.f32.mrb[5].mxu0  ;;  %v4128_v60 = vadd.f32 %v4127_v4, %v3073_v56  ;;  %v4088_v61 = vpop.f32.mrb[26].mxu1 }
 0x1c7   :  { %3600 = vst [vmem:[#allocation8 + $0x38] sm:$0xff] %v3582_v52   ;;  %v3547_v62 = vpack.c.bf16 %v3176_v53, %v3175_v51  ;;  %v3173_v63 = vadd.f32 %v4126_v55, %v4644_v10  ;;  %v4110_v0 = vadd.f32 %v3025_v59, %v4627_v43  ;;  %v4076_v2 = vpop.f32.mrb[6].mxu0  ;;  %v4130_v3 = vadd.f32 %v4129_v7, %v4088_v61  ;;  %v3076_v5 = vpop.f32.mrb[27].mxu1 }
 0x1c8   :  { %3594 = vst [vmem:[#allocation8 + $0x8] sm:$0xff] %v3552_v41   ;;  %3599 = vst [vmem:[#allocation8 + $0x30] sm:$0xff] %v3577_v57   ;;  %v3161_v1 = vadd.f32 %v4109_v58, %v4644_v10  ;;  %v3171_v6 = vadd.f32 %v4128_v60, %v4644_v10  ;;  %v4111_v42 = vadd.f32 %v4076_v2, %v4629_v44  ;;  %v3028_v8 = vpop.f32.mrb[7].mxu0 }
 0x1c9   :  { %v4132_v4 = vadd.f32 %v4131_v9, %v3076_v5  ;;  %3548 = vst [vmem:[#allocation8] sm:$0xff] %v3547_v62   ;;  %v3159_v11 = vadd.f32 %v4110_v0, %v4644_v10  ;;  %v3174_v12 = vadd.f32 %v4130_v3, %v4644_v10  ;;  %v4112_v43 = vadd.f32 %v3028_v8, %v4631_v45 }
 0x1ca   :  { %v3162_v7 = vadd.f32 %v4111_v42, %v4644_v10  ;;  %v3193_v14 = vmax.f32 %v3173_v63, 0.0  ;;  %v3181_v17 = vmax.f32 %v3161_v1, 0.0  ;;  %v3191_v18 = vmax.f32 %v3171_v6, 0.0 }
 0x1cb   :  { %v3172_v13 = vadd.f32 %v4132_v4, %v4644_v10  ;;  %v3194_v15 = vmax.f32 %v3174_v12, 0.0  ;;  %v3160_v16 = vadd.f32 %v4112_v43, %v4644_v10  ;;  %v3179_v9 = vmax.f32 %v3159_v11, 0.0 }
 0x1cc   :  { %v3182_v44 = vmax.f32 %v3162_v7, 0.0 }
 0x1cd   :  { %v3192_v19 = vmax.f32 %v3172_v13, 0.0  ;;  %v3592_v20 = vpack.c.bf16 %v3194_v15, %v3193_v14  ;;  %v3180_v21 = vmax.f32 %v3160_v16, 0.0  ;;  %v4079_v22 = vpop.f32.mrb[8].mxu0 }
 0x1ce   :  { %v3562_v23 = vpack.c.bf16 %v3182_v44, %v3181_v17  ;;  %v4113_v45 = vadd.f32 %v4079_v22, %v4633_v46  ;;  %v3041_v25 = vpop.f32.mrb[9].mxu0 }
 0x1cf   :  { %v3587_v24 = vpack.c.bf16 %v3192_v19, %v3191_v18  ;;  %3602 = vst [vmem:[#allocation8 + $0x48] sm:$0xff] %v3592_v20   ;;  %v3557_v26 = vpack.c.bf16 %v3180_v21, %v3179_v9  ;;  %v4114_v27 = vadd.f32 %v3041_v25, %v4635_v47  ;;  %v4080_v28 = vpop.f32.mrb[10].mxu0 }
 0x1d0   :  { %3596 = vst [vmem:[#allocation8 + $0x18] sm:$0xff] %v3562_v23   ;;  %v3165_v29 = vadd.f32 %v4113_v45, %v4644_v10  ;;  %v4115_v30 = vadd.f32 %v4080_v28, %v4637_v48  ;;  %v3044_v31 = vpop.f32.mrb[11].mxu0 }
 0x1d1   :  { %3601 = vst [vmem:[#allocation8 + $0x40] sm:$0xff] %v3587_v24   ;;  %3595 = vst [vmem:[#allocation8 + $0x10] sm:$0xff] %v3557_v26   ;;  %v3163_v32 = vadd.f32 %v4114_v27, %v4644_v10  ;;  %v4116_v33 = vadd.f32 %v3044_v31, %v4639_v49 }
 0x1d2   :  { %v3166_v46 = vadd.f32 %v4115_v30, %v4644_v10  ;;  %v3185_v35 = vmax.f32 %v3165_v29, 0.0 }
 0x1d3   :  { %v3164_v34 = vadd.f32 %v4116_v33, %v4644_v10  ;;  %v3183_v47 = vmax.f32 %v3163_v32, 0.0 }
 0x1d4   :  { %v3186_v36 = vmax.f32 %v3166_v46, 0.0 }
 0x1d5   :  { %v3184_v37 = vmax.f32 %v3164_v34, 0.0 }
 0x1d6   :  { %v3572_v38 = vpack.c.bf16 %v3186_v36, %v3185_v35 }
 0x1d7   :  { %v3567_v39 = vpack.c.bf16 %v3184_v37, %v3183_v47 }
 0x1d8   :  { %3598 = vst [vmem:[#allocation8 + $0x28] sm:$0xff] %v3572_v38  }
 0x1d9   :  { %3597 = vst [vmem:[#allocation8 + $0x20] sm:$0xff] %v3567_v39  }
 0x1da   :  { %4493 = shalt.err (!%p4490_p8)
}
 0x1db   :  { %s4494_s19 = scalar_lea.hbm %s4692_s3, 1280 }
 0x1dc   :  { %p4495_p9 = scmp.ne.s32.totalorder %s4692_s3, %s4494_s19  ;;  %p4498_p10 = scmp.lt.u32.totalorder %s4494_s19, %s4692_s3 }
 0x1de   :  { %p4500_p11 = pnand %p4498_p10, %p4495_p9 }
 0x1e0   :  { %4503 = shalt.err (!%p4500_p11)
}
 0x1e1   :  { %3306 = dma.vmem_to_hbm [thread:$0]  %s3301_s15, 1280, %s4692_s3, [#allocation7], %s4511_s22, %s4511_s22, %s4512_s23  }
 0x1e2   :  { %4508 = dma.done.wait [#allocation7], 1280  }
 0x1e3   :  { %4509 = vsyncadd [#allocation7], 4294966016 }
 0x1e4   :  { %3310 = vsyncpa [#allocation6], 1 }
 0x1e5   :  { %3311 = vsyncpa [#allocation7], 1 }
 0x1e6   :  { %3312 = vsyncmov [#allocation3] }
 0x1e9   :  { %s3313_s28 = vpop.sfrf %3312 }
 0x1ea   :  { %p3522_p12 = scmp.ne.s32.totalorder %s3313_s28, 0 }
 0x1ec   :  { %3317 = shalt.err (%p3522_p12)  }
 0x1ed   :  { %3319 = vsyncmov [#allocation3 + $0x1] }
 0x1f0   :  { %s3320_s29 = vpop.sfrf %3319 }
 0x1f1   :  { %p3523_p13 = scmp.ne.s32.totalorder %s3320_s29, 0 }
 0x1f3   :  { %3324 = shalt.err (%p3523_p13)  }

</bundles_post_ra>
